<compile_context>
chip_gen: v5e
topology: v5e:2x2
jax: 0.10.0
libtpu: 0.0.40
codegen_flags: <defaults>
</compile_context>

<pallas_src>
import jax
import jax.numpy as jnp
from jax import lax
from jax.experimental import pallas as pl
from jax.experimental.pallas import tpu as pltpu

TAU = 2.0        # LIFNode default tau
V_TH = 1.0       # LIFNode default v_threshold
BN_EPS = 1e-3    # BatchNorm2d(eps=0.001)


# ---------------- kernel 1: fused depthwise conv + folded-BN + LIF spike ----------------
def make_dw_kernel(H, W, K, tc):
    def dw_kernel(xp_ref, w_ref, thr_ref, o_ref):
        # xp_ref : (1, H+K-1, W+K-1, tc)  zero-padded input (Conv2d zero padding)
        # w_ref  : (K, K, tc)             BN-scale-folded depthwise weights
        # thr_ref: (1, tc)                per-channel spike threshold = TAU*V_TH - bias
        # o_ref  : (1, H, W, tc)          bf16 spikes in {0,1}
        xp = xp_ref[...]
        w = w_ref[...]
        acc = jnp.zeros((1, H, W, tc), jnp.float32)
        for kh in range(K):
            for kw in range(K):
                wv = w[kh, kw].reshape(1, 1, 1, tc)
                acc = acc + xp[:, kh:kh + H, kw:kw + W, :] * wv
        thr = thr_ref[...].reshape(1, 1, 1, tc)
        o_ref[...] = (acc >= thr).astype(o_ref.dtype)
    return dw_kernel


def dwconv_bn_lif(xpad, w_kkc, thr, H, W, K):
    # xpad: (N, H+K-1, W+K-1, C) f32 ; w_kkc: (K, K, C) ; thr: (1, C)
    N, Hp, Wp, C = xpad.shape
    tc = 128 if (C % 128 == 0) else C       # lane-dense channel blocks when possible
    nc = C // tc
    kern = make_dw_kernel(H, W, K, tc)
    return pl.pallas_call(
        kern,
        out_shape=jax.ShapeDtypeStruct((N, H, W, C), jnp.bfloat16),
        grid_spec=pltpu.PrefetchScalarGridSpec(
            num_scalar_prefetch=0,
            grid=(N, nc),
            in_specs=[
                pl.BlockSpec((1, Hp, Wp, tc), lambda n, c: (n, 0, 0, c)),
                pl.BlockSpec((K, K, tc), lambda n, c: (0, 0, c)),
                pl.BlockSpec((1, tc), lambda n, c: (0, c)),
            ],
            out_specs=pl.BlockSpec((1, H, W, tc), lambda n, c: (n, 0, 0, c)),
        ),
        compiler_params=pltpu.CompilerParams(
            dimension_semantics=("parallel", "parallel")),
    )(xpad, w_kkc, thr)


# ---------------- kernel 2: fused pointwise 1x1 conv + folded-BN + LIF spike ----------------
def pw_kernel(x_ref, w_ref, thr_ref, o_ref):
    # x_ref: (tm, Cin) bf16 spikes, w_ref: (Cin, Cout) f32 (scale-folded),
    # thr_ref: (1, Cout), o_ref: (tm, Cout) f32 spikes
    x = x_ref[...].astype(jnp.float32)      # bf16 {0,1} -> f32, exact
    y = jnp.dot(x, w_ref[...], preferred_element_type=jnp.float32)
    o_ref[...] = (y >= thr_ref[...]).astype(o_ref.dtype)


def _choose_tm(M, cin, cout):
    # Largest row-tile whose double-buffered bf16 input + f32 output tiles plus the
    # resident weight fit well inside the smallest (v7x) scoped-VMEM default.
    budget = 24 * 1024 * 1024
    tm = 1024
    while tm > 128 and 2 * (tm * cin * 2 + tm * cout * 4) + cin * cout * 4 > budget:
        tm //= 2
    if M <= tm:
        return M
    return tm


def pwconv_bn_lif(x2d, w, thr):
    M, cin = x2d.shape
    cout = w.shape[1]
    tm = _choose_tm(M, cin, cout)
    return pl.pallas_call(
        pw_kernel,
        out_shape=jax.ShapeDtypeStruct((M, cout), jnp.float32),
        grid_spec=pltpu.PrefetchScalarGridSpec(
            num_scalar_prefetch=0,
            grid=(pl.cdiv(M, tm),),
            in_specs=[
                pl.BlockSpec((tm, cin), lambda i: (i, 0)),
                pl.BlockSpec((cin, cout), lambda i: (0, 0)),
                pl.BlockSpec((1, cout), lambda i: (0, 0)),
            ],
            out_specs=pl.BlockSpec((tm, cout), lambda i: (i, 0)),
        ),
        compiler_params=pltpu.CompilerParams(dimension_semantics=("parallel",)),
    )(x2d, w, thr)


# ---------------- full forward (Pallas) ----------------
@jax.jit
def dwconv_snn(x_nchw, dw, pw, scale1, bias1, scale2, bias2):
    # dw: (C, 1, K, K) torch depthwise weight; pw: (Cout, C, 1, 1) torch 1x1 weight
    # TODO(synk): stride > 1 depthwise path not implemented (module default stride=1).
    N, C, H, W = x_nchw.shape
    K = dw.shape[-1]
    p = (K - 1) // 2
    Cout = pw.shape[0]

    # NCHW -> NHWC (channels on lanes); zero padding == Conv2d padding.
    x_nhwc = jnp.transpose(x_nchw, (0, 2, 3, 1)).astype(jnp.float32)
    xpad = jnp.pad(x_nhwc, ((0, 0), (p, p), (p, p), (0, 0)))

    # Fold eval-mode BN into the weights and a per-channel threshold:
    #   spike = ((conv*scale + bias)/TAU >= V_TH)  <=>  conv_scaled >= TAU*V_TH - bias
    dw_kkc = jnp.transpose(dw[:, 0], (1, 2, 0)) * scale1[None, None, :]      # (K,K,C)
    thr1 = (TAU * V_TH - bias1).reshape(1, C)
    pw_f = (pw[:, :, 0, 0] * scale2[:, None]).T.astype(jnp.float32)          # (C,Cout)
    thr2 = (TAU * V_TH - bias2).reshape(1, Cout)

    y1 = dwconv_bn_lif(xpad, dw_kkc, thr1, H, W, K)                          # (N,H,W,C) bf16
    y2 = pwconv_bn_lif(y1.reshape(N * H * W, C), pw_f, thr2)                 # (M,Cout) f32
    return jnp.transpose(y2.reshape(N, H, W, Cout), (0, 3, 1, 2))            # back to NCHW


# ---------------- deterministic parameter construction ----------------
def make_params(in_channels, out_channels, ksize, key):
    ks = jax.random.split(key, 4)

    def bn_params(k, c):
        k1, k2, k3, k4 = jax.random.split(k, 4)
        gamma = jax.random.uniform(k1, (c,), jnp.float32, 0.5, 1.5)
        beta = jax.random.uniform(k2, (c,), jnp.float32, 0.0, 1.0)
        rmean = 0.1 * jax.random.normal(k3, (c,), jnp.float32)
        rvar = jax.random.uniform(k4, (c,), jnp.float32, 0.05, 0.5)
        scale = gamma / jnp.sqrt(rvar + BN_EPS)
        bias = beta - rmean * scale
        return scale, bias

    dw = 0.3 * jax.random.normal(ks[0], (in_channels, 1, ksize, ksize), jnp.float32)
    pw = 1.0 * jax.random.normal(ks[1], (out_channels, in_channels, 1, 1), jnp.float32)
    s1, b1 = bn_params(ks[2], in_channels)
    s2, b2 = bn_params(ks[3], out_channels)
    return dict(dw=dw, pw=pw, scale1=s1, bias1=b1, scale2=s2, bias2=b2)


# ---------------- pure-JAX reference for validation ----------------
def ref_forward(x_nchw, dw, pw, scale1, bias1, scale2, bias2):
    C = x_nchw.shape[1]
    K = dw.shape[-1]
    p = (K - 1) // 2

    def bn_lif(y, s, b):
        y = y * s[None, :, None, None] + b[None, :, None, None]
        return ((y / TAU) >= V_TH).astype(jnp.float32)

    y = lax.conv_general_dilated(
        x_nchw, dw, window_strides=(1, 1), padding=((p, p), (p, p)),
        dimension_numbers=("NCHW", "OIHW", "NCHW"), feature_group_count=C,
        precision=lax.Precision.HIGHEST)
    y = bn_lif(y, scale1, bias1)
    y = lax.conv_general_dilated(
        y, pw, window_strides=(1, 1), padding=((0, 0), (0, 0)),
        dimension_numbers=("NCHW", "OIHW", "NCHW"),
        precision=lax.Precision.HIGHEST)
    return bn_lif(y, scale2, bias2)


if __name__ == "__main__":
    N, Cin, H, W = 2, 4, 16, 16
    Cout = 8
    K = 3

    kx, kp = jax.random.split(jax.random.PRNGKey(0))
    x = 2.0 * jax.random.normal(kx, (N, Cin, H, W), jnp.float32)
    p = make_params(Cin, Cout, K, kp)

    out = dwconv_snn(x, p["dw"], p["pw"], p["scale1"], p["bias1"],
                     p["scale2"], p["bias2"])
    out = jax.block_until_ready(out)
    assert out.shape == (N, Cout, H, W), out.shape

    ref = ref_forward(x, p["dw"], p["pw"], p["scale1"], p["bias1"],
                      p["scale2"], p["bias2"])
    assert jnp.allclose(out, ref, atol=1e-5), "mismatch vs pure-JAX reference"

    print("KERNEL_OK")
</pallas_src>

<mosaic_0001>
module attributes {stable_mosaic.version = 11 : i64} {
  func.func @dw_kernel(%arg0: i32, %arg1: i32, %arg2: memref<1x18x18x4xf32, #tpu.memory_space<vmem>>, %arg3: memref<3x3x4xf32, #tpu.memory_space<vmem>>, %arg4: memref<1x4xf32, #tpu.memory_space<vmem>>, %arg5: memref<1x16x16x4xbf16, #tpu.memory_space<vmem>>) attributes {dimension_semantics = [#tpu.dimension_semantics<parallel>, #tpu.dimension_semantics<parallel>], iteration_bounds = array<i64: 2, 1>, scalar_prefetch = 0 : i64, scratch_operands = 0 : i64, tpu.core_type = #tpu.core_type<tc>, window_params = [{transform_indices = @transform_0, window_bounds = array<i64: 1, 18, 18, 4>}, {transform_indices = @transform_1, window_bounds = array<i64: 3, 3, 4>}, {transform_indices = @transform_2, window_bounds = array<i64: 1, 4>}, {transform_indices = @transform_3, window_bounds = array<i64: 1, 16, 16, 4>}]} {
    %c0 = arith.constant 0 : index
    %c0_0 = arith.constant 0 : index
    %c0_1 = arith.constant 0 : index
    %c0_2 = arith.constant 0 : index
    %0 = vector.load %arg2[%c0, %c0_0, %c0_1, %c0_2] : memref<1x18x18x4xf32, #tpu.memory_space<vmem>>, vector<1x18x18x4xf32>
    %c0_3 = arith.constant 0 : index
    %c0_4 = arith.constant 0 : index
    %c0_5 = arith.constant 0 : index
    %1 = vector.load %arg3[%c0_3, %c0_4, %c0_5] : memref<3x3x4xf32, #tpu.memory_space<vmem>>, vector<3x3x4xf32>
    %cst = arith.constant 0.000000e+00 : f32
    %2 = vector.broadcast %cst : f32 to vector<1x16x16x4xf32>
    %3 = vector.extract_strided_slice %1 {offsets = [0, 0, 0], sizes = [1, 1, 4], strides = [1, 1, 1]} : vector<3x3x4xf32> to vector<1x1x4xf32>
    %4 = vector.shape_cast %3 : vector<1x1x4xf32> to vector<4xf32>
    %5 = vector.shape_cast %4 : vector<4xf32> to vector<1x1x1x4xf32>
    %6 = vector.extract_strided_slice %0 {offsets = [0, 0, 0, 0], sizes = [1, 16, 16, 4], strides = [1, 1, 1, 1]} : vector<1x18x18x4xf32> to vector<1x16x16x4xf32>
    %7 = vector.broadcast %5 : vector<1x1x1x4xf32> to vector<1x16x16x4xf32>
    %8 = arith.mulf %6, %7 : vector<1x16x16x4xf32>
    %9 = arith.addf %2, %8 : vector<1x16x16x4xf32>
    %10 = vector.extract_strided_slice %1 {offsets = [0, 1, 0], sizes = [1, 1, 4], strides = [1, 1, 1]} : vector<3x3x4xf32> to vector<1x1x4xf32>
    %11 = vector.shape_cast %10 : vector<1x1x4xf32> to vector<4xf32>
    %12 = vector.shape_cast %11 : vector<4xf32> to vector<1x1x1x4xf32>
    %13 = vector.extract_strided_slice %0 {offsets = [0, 0, 1, 0], sizes = [1, 16, 16, 4], strides = [1, 1, 1, 1]} : vector<1x18x18x4xf32> to vector<1x16x16x4xf32>
    %14 = vector.broadcast %12 : vector<1x1x1x4xf32> to vector<1x16x16x4xf32>
    %15 = arith.mulf %13, %14 : vector<1x16x16x4xf32>
    %16 = arith.addf %9, %15 : vector<1x16x16x4xf32>
    %17 = vector.extract_strided_slice %1 {offsets = [0, 2, 0], sizes = [1, 1, 4], strides = [1, 1, 1]} : vector<3x3x4xf32> to vector<1x1x4xf32>
    %18 = vector.shape_cast %17 : vector<1x1x4xf32> to vector<4xf32>
    %19 = vector.shape_cast %18 : vector<4xf32> to vector<1x1x1x4xf32>
    %20 = vector.extract_strided_slice %0 {offsets = [0, 0, 2, 0], sizes = [1, 16, 16, 4], strides = [1, 1, 1, 1]} : vector<1x18x18x4xf32> to vector<1x16x16x4xf32>
    %21 = vector.broadcast %19 : vector<1x1x1x4xf32> to vector<1x16x16x4xf32>
    %22 = arith.mulf %20, %21 : vector<1x16x16x4xf32>
    %23 = arith.addf %16, %22 : vector<1x16x16x4xf32>
    %24 = vector.extract_strided_slice %1 {offsets = [1, 0, 0], sizes = [1, 1, 4], strides = [1, 1, 1]} : vector<3x3x4xf32> to vector<1x1x4xf32>
    %25 = vector.shape_cast %24 : vector<1x1x4xf32> to vector<4xf32>
    %26 = vector.shape_cast %25 : vector<4xf32> to vector<1x1x1x4xf32>
    %27 = vector.extract_strided_slice %0 {offsets = [0, 1, 0, 0], sizes = [1, 16, 16, 4], strides = [1, 1, 1, 1]} : vector<1x18x18x4xf32> to vector<1x16x16x4xf32>
    %28 = vector.broadcast %26 : vector<1x1x1x4xf32> to vector<1x16x16x4xf32>
    %29 = arith.mulf %27, %28 : vector<1x16x16x4xf32>
    %30 = arith.addf %23, %29 : vector<1x16x16x4xf32>
    %31 = vector.extract_strided_slice %1 {offsets = [1, 1, 0], sizes = [1, 1, 4], strides = [1, 1, 1]} : vector<3x3x4xf32> to vector<1x1x4xf32>
    %32 = vector.shape_cast %31 : vector<1x1x4xf32> to vector<4xf32>
    %33 = vector.shape_cast %32 : vector<4xf32> to vector<1x1x1x4xf32>
    %34 = vector.extract_strided_slice %0 {offsets = [0, 1, 1, 0], sizes = [1, 16, 16, 4], strides = [1, 1, 1, 1]} : vector<1x18x18x4xf32> to vector<1x16x16x4xf32>
    %35 = vector.broadcast %33 : vector<1x1x1x4xf32> to vector<1x16x16x4xf32>
    %36 = arith.mulf %34, %35 : vector<1x16x16x4xf32>
    %37 = arith.addf %30, %36 : vector<1x16x16x4xf32>
    %38 = vector.extract_strided_slice %1 {offsets = [1, 2, 0], sizes = [1, 1, 4], strides = [1, 1, 1]} : vector<3x3x4xf32> to vector<1x1x4xf32>
    %39 = vector.shape_cast %38 : vector<1x1x4xf32> to vector<4xf32>
    %40 = vector.shape_cast %39 : vector<4xf32> to vector<1x1x1x4xf32>
    %41 = vector.extract_strided_slice %0 {offsets = [0, 1, 2, 0], sizes = [1, 16, 16, 4], strides = [1, 1, 1, 1]} : vector<1x18x18x4xf32> to vector<1x16x16x4xf32>
    %42 = vector.broadcast %40 : vector<1x1x1x4xf32> to vector<1x16x16x4xf32>
    %43 = arith.mulf %41, %42 : vector<1x16x16x4xf32>
    %44 = arith.addf %37, %43 : vector<1x16x16x4xf32>
    %45 = vector.extract_strided_slice %1 {offsets = [2, 0, 0], sizes = [1, 1, 4], strides = [1, 1, 1]} : vector<3x3x4xf32> to vector<1x1x4xf32>
    %46 = vector.shape_cast %45 : vector<1x1x4xf32> to vector<4xf32>
    %47 = vector.shape_cast %46 : vector<4xf32> to vector<1x1x1x4xf32>
    %48 = vector.extract_strided_slice %0 {offsets = [0, 2, 0, 0], sizes = [1, 16, 16, 4], strides = [1, 1, 1, 1]} : vector<1x18x18x4xf32> to vector<1x16x16x4xf32>
    %49 = vector.broadcast %47 : vector<1x1x1x4xf32> to vector<1x16x16x4xf32>
    %50 = arith.mulf %48, %49 : vector<1x16x16x4xf32>
    %51 = arith.addf %44, %50 : vector<1x16x16x4xf32>
    %52 = vector.extract_strided_slice %1 {offsets = [2, 1, 0], sizes = [1, 1, 4], strides = [1, 1, 1]} : vector<3x3x4xf32> to vector<1x1x4xf32>
    %53 = vector.shape_cast %52 : vector<1x1x4xf32> to vector<4xf32>
    %54 = vector.shape_cast %53 : vector<4xf32> to vector<1x1x1x4xf32>
    %55 = vector.extract_strided_slice %0 {offsets = [0, 2, 1, 0], sizes = [1, 16, 16, 4], strides = [1, 1, 1, 1]} : vector<1x18x18x4xf32> to vector<1x16x16x4xf32>
    %56 = vector.broadcast %54 : vector<1x1x1x4xf32> to vector<1x16x16x4xf32>
    %57 = arith.mulf %55, %56 : vector<1x16x16x4xf32>
    %58 = arith.addf %51, %57 : vector<1x16x16x4xf32>
    %59 = vector.extract_strided_slice %1 {offsets = [2, 2, 0], sizes = [1, 1, 4], strides = [1, 1, 1]} : vector<3x3x4xf32> to vector<1x1x4xf32>
    %60 = vector.shape_cast %59 : vector<1x1x4xf32> to vector<4xf32>
    %61 = vector.shape_cast %60 : vector<4xf32> to vector<1x1x1x4xf32>
    %62 = vector.extract_strided_slice %0 {offsets = [0, 2, 2, 0], sizes = [1, 16, 16, 4], strides = [1, 1, 1, 1]} : vector<1x18x18x4xf32> to vector<1x16x16x4xf32>
    %63 = vector.broadcast %61 : vector<1x1x1x4xf32> to vector<1x16x16x4xf32>
    %64 = arith.mulf %62, %63 : vector<1x16x16x4xf32>
    %65 = arith.addf %58, %64 : vector<1x16x16x4xf32>
    %c0_6 = arith.constant 0 : index
    %c0_7 = arith.constant 0 : index
    %66 = vector.load %arg4[%c0_6, %c0_7] : memref<1x4xf32, #tpu.memory_space<vmem>>, vector<1x4xf32>
    %67 = vector.shape_cast %66 : vector<1x4xf32> to vector<1x1x1x4xf32>
    %68 = vector.broadcast %67 : vector<1x1x1x4xf32> to vector<1x16x16x4xf32>
    %69 = arith.cmpf oge, %65, %68 : vector<1x16x16x4xf32>
    %70 = arith.extui %69 : vector<1x16x16x4xi1> to vector<1x16x16x4xi32>
    %71 = arith.sitofp %70 : vector<1x16x16x4xi32> to vector<1x16x16x4xf32>
    %72 = arith.truncf %71 : vector<1x16x16x4xf32> to vector<1x16x16x4xbf16>
    %c0_8 = arith.constant 0 : index
    %c0_9 = arith.constant 0 : index
    %c0_10 = arith.constant 0 : index
    %c0_11 = arith.constant 0 : index
    %73 = vector.load %arg5[%c0_8, %c0_9, %c0_10, %c0_11] : memref<1x16x16x4xbf16, #tpu.memory_space<vmem>>, vector<1x16x16x4xbf16>
    tpu.vector_store %arg5[%c0_8, %c0_9, %c0_10, %c0_11], %72 {strides = array<i32>} : memref<1x16x16x4xbf16, #tpu.memory_space<vmem>>, vector<1x16x16x4xbf16>,
    return
  }
  func.func @transform_0(%arg0: i32, %arg1: i32) -> (i32, i32, i32, i32) {
    %c0_i32 = arith.constant 0 : i32
    %c0_i32_0 = arith.constant 0 : i32
    %c0_i32_1 = arith.constant 0 : i32
    return %arg0, %c0_i32, %c0_i32_0, %arg1 : i32, i32, i32, i32
  }
  func.func @transform_1(%arg0: i32, %arg1: i32) -> (i32, i32, i32) {
    %c0_i32 = arith.constant 0 : i32
    %c0_i32_0 = arith.constant 0 : i32
    %c0_i32_1 = arith.constant 0 : i32
    return %c0_i32, %c0_i32_0, %arg1 : i32, i32, i32
  }
  func.func @transform_2(%arg0: i32, %arg1: i32) -> (i32, i32) {
    %c0_i32 = arith.constant 0 : i32
    %c0_i32_0 = arith.constant 0 : i32
    return %c0_i32, %arg1 : i32, i32
  }
  func.func @transform_3(%arg0: i32, %arg1: i32) -> (i32, i32, i32, i32) {
    %c0_i32 = arith.constant 0 : i32
    %c0_i32_0 = arith.constant 0 : i32
    %c0_i32_1 = arith.constant 0 : i32
    return %arg0, %c0_i32, %c0_i32_0, %arg1 : i32, i32, i32, i32
  }
}

module attributes {stable_mosaic.version = 11 : i64} {
  func.func @pw_kernel(%arg0: i32, %arg1: memref<512x4xbf16, #tpu.memory_space<vmem>>, %arg2: memref<4x8xf32, #tpu.memory_space<vmem>>, %arg3: memref<1x8xf32, #tpu.memory_space<vmem>>, %arg4: memref<512x8xf32, #tpu.memory_space<vmem>>) attributes {dimension_semantics = [#tpu.dimension_semantics<parallel>], iteration_bounds = array<i64: 1>, scalar_prefetch = 0 : i64, scratch_operands = 0 : i64, tpu.core_type = #tpu.core_type<tc>, window_params = [{transform_indices = @transform_0, window_bounds = array<i64: 512, 4>}, {pipeline_mode = #tpu.pipeline_mode<synchronous>, transform_indices = @transform_1, window_bounds = array<i64: 4, 8>}, {pipeline_mode = #tpu.pipeline_mode<synchronous>, transform_indices = @transform_2, window_bounds = array<i64: 1, 8>}, {transform_indices = @transform_3, window_bounds = array<i64: 512, 8>}]} {
    %c0 = arith.constant 0 : index
    %c0_0 = arith.constant 0 : index
    %0 = vector.load %arg1[%c0, %c0_0] : memref<512x4xbf16, #tpu.memory_space<vmem>>, vector<512x4xbf16>
    %1 = arith.extf %0 : vector<512x4xbf16> to vector<512x4xf32>
    %c0_1 = arith.constant 0 : index
    %c0_2 = arith.constant 0 : index
    %2 = vector.load %arg2[%c0_1, %c0_2] : memref<4x8xf32, #tpu.memory_space<vmem>>, vector<4x8xf32>
    %cst = arith.constant dense<0.000000e+00> : vector<512x8xf32>
    %3 = tpu.matmul %1, %2, %cst {dimension_numbers = #tpu.dot_dimension_numbers<[1], [0], [0], [1], [0, 0, 1, 1], [], []>} : vector<512x4xf32>, vector<4x8xf32>, vector<512x8xf32> -> vector<512x8xf32>
    %c0_3 = arith.constant 0 : index
    %c0_4 = arith.constant 0 : index
    %4 = vector.load %arg3[%c0_3, %c0_4] : memref<1x8xf32, #tpu.memory_space<vmem>>, vector<1x8xf32>
    %5 = vector.broadcast %4 : vector<1x8xf32> to vector<512x8xf32>
    %6 = arith.cmpf oge, %3, %5 : vector<512x8xf32>
    %7 = arith.extui %6 : vector<512x8xi1> to vector<512x8xi32>
    %8 = arith.sitofp %7 : vector<512x8xi32> to vector<512x8xf32>
    %c0_5 = arith.constant 0 : index
    %c0_6 = arith.constant 0 : index
    %9 = vector.load %arg4[%c0_5, %c0_6] : memref<512x8xf32, #tpu.memory_space<vmem>>, vector<512x8xf32>
    tpu.vector_store %arg4[%c0_5, %c0_6], %8 {strides = array<i32>} : memref<512x8xf32, #tpu.memory_space<vmem>>, vector<512x8xf32>,
    return
  }
  func.func @transform_0(%arg0: i32) -> (i32, i32) {
    %c0_i32 = arith.constant 0 : i32
    %c0_i32_0 = arith.constant 0 : i32
    return %arg0, %c0_i32 : i32, i32
  }
  func.func @transform_1(%arg0: i32) -> (i32, i32) {
    %c0_i32 = arith.constant 0 : i32
    %c0_i32_0 = arith.constant 0 : i32
    %c0_i32_1 = arith.constant 0 : i32
    return %c0_i32, %c0_i32_0 : i32, i32
  }
  func.func @transform_2(%arg0: i32) -> (i32, i32) {
    %c0_i32 = arith.constant 0 : i32
    %c0_i32_0 = arith.constant 0 : i32
    %c0_i32_1 = arith.constant 0 : i32
    return %c0_i32, %c0_i32_0 : i32, i32
  }
  func.func @transform_3(%arg0: i32) -> (i32, i32) {
    %c0_i32 = arith.constant 0 : i32
    %c0_i32_0 = arith.constant 0 : i32
    return %arg0, %c0_i32 : i32, i32
  }
}

</mosaic_0001>

<bundles_post_ra>
// kernel: dwconv_snn.3
= control target key start
LH: loop header
LB: loop body
LE: loop exit
PB: predicated region body
PF: predicated region fallthrough
CT: control target
= control target key end

     0   :  { %vm336_vm0 = vcmask 1043456   ;;  %vm143_vm1 = vcmask 31744   ;;  %vm745_vm2 = vcmask 64512   ;;  %s1680_s1 = inlined_call_operand.vmem [shape: f32[4,8], index: 1, kind: input, shape index: {}]   ;;  %s1681_s0 = inlined_call_operand.vmem [shape: bf16[512,4], index: 0, kind: input, shape index: {}]   ;;  %s1682_s2 = inlined_call_operand.vmem [shape: f32[1,8], index: 2, kind: input, shape index: {}]   ;;  %s1683_s3 = inlined_call_operand.vmem [shape: f32[512,8], index: 3, kind: output, shape index: {}]  }
   0x1   :  { %v142_v0 = vld [vmem:[%s1680_s1] sm:$0xf]  ;;  %v1087_v13 = vld [vmem:[%s1681_s0 + $0x88] sm:$0xff]   ;;  %v1088_v25 = vld [vmem:[%s1681_s0 + $0x90] sm:$0xff]  }
   0x2   :  { %v1086_v1 = vld [vmem:[%s1681_s0 + $0x80] sm:$0xff]   ;;  %1103 = vmatpush.msk.msra.mxu2 %vm336_vm0, %v142_v0  ;;  %1104 = vmatpush.msk.msra.mxu3 %vm336_vm0, %v142_v0  ;;  %v1095_v14 = vld [vmem:[%s1681_s0 + $0xc8] sm:$0xff]   ;;  %v1013_v17 = vunpack.c.l.bf16 %v1087_v13  ;;  %v1014_v21 = vunpack.c.h.bf16 %v1087_v13  ;;  %v1096_v26 = vld [vmem:[%s1681_s0 + $0xd0] sm:$0xff]   ;;  %v1017_v29 = vunpack.c.l.bf16 %v1088_v25  ;;  %v1018_v33 = vunpack.c.h.bf16 %v1088_v25 }
   0x3   :  { %v1094_v2 = vld [vmem:[%s1681_s0 + $0xc0] sm:$0xff]   ;;  %v1009_v3 = vunpack.c.l.bf16 %v1086_v1  ;;  %814 = vmatpush.msk.msra.mxu0 %vm336_vm0, %v142_v0  ;;  %1102 = vmatpush.msk.msra.mxu1 %vm336_vm0, %v142_v0  ;;  %v1010_v9 = vunpack.c.h.bf16 %v1086_v1  ;;  %v1071_v15 = vld [vmem:[%s1681_s0 + $0x8] sm:$0xff]   ;;  %v1045_v18 = vunpack.c.l.bf16 %v1095_v14  ;;  %v1046_v22 = vunpack.c.h.bf16 %v1095_v14  ;;  %v1072_v27 = vld [vmem:[%s1681_s0 + $0x10] sm:$0xff]  }
   0x4   :  { %v1041_v4 = vunpack.c.l.bf16 %v1094_v2  ;;  %v944_v5 = vld [vmem:[%s1681_s0] sm:$0xff]   ;;  %v1042_v10 = vunpack.c.h.bf16 %v1094_v2  ;;  %v1079_v16 = vld [vmem:[%s1681_s0 + $0x48] sm:$0xff]   ;;  %v949_v19 = vunpack.c.l.bf16 %v1071_v15  ;;  %v950_v23 = vunpack.c.h.bf16 %v1071_v15  ;;  %v1080_v28 = vld [vmem:[%s1681_s0 + $0x50] sm:$0xff]  }
   0x5   :  { %v1078_v6 = vld [vmem:[%s1681_s0 + $0x40] sm:$0xff]   ;;  %v945_v7 = vunpack.c.l.bf16 %v944_v5  ;;  %847 = vmatmul.msk.f32.vlgmr.msra.gmra.mxu2 %vm143_vm1, %v1009_v3  ;;  %v946_v11 = vunpack.c.h.bf16 %v944_v5  ;;  %v981_v20 = vunpack.c.l.bf16 %v1079_v16  ;;  %v982_v24 = vunpack.c.h.bf16 %v1079_v16  ;;  %v1089_v37 = vld [vmem:[%s1681_s0 + $0x98] sm:$0xff]   ;;  %v1091_v61 = vld [vmem:[%s1681_s0 + $0xa8] sm:$0xff]  }
   0x6   :  { %v977_v8 = vunpack.c.l.bf16 %v1078_v6  ;;  %863 = vmatmul.msk.f32.vlgmr.msra.gmra.mxu3 %vm143_vm1, %v1041_v4  ;;  %v978_v12 = vunpack.c.h.bf16 %v1078_v6  ;;  %v1049_v30 = vunpack.c.l.bf16 %v1096_v26  ;;  %v953_v31 = vunpack.c.l.bf16 %v1072_v27  ;;  %v1097_v38 = vld [vmem:[%s1681_s0 + $0xd8] sm:$0xff]   ;;  %v1090_v49 = vld [vmem:[%s1681_s0 + $0xa0] sm:$0xff]   ;;  %v1099_v62 = vld [vmem:[%s1681_s0 + $0xe8] sm:$0xff]  }
   0x7   :  { %815 = vmatmul.msk.f32.vlgmr.msra.gmra.mxu0 %vm143_vm1, %v945_v7  ;;  %v985_v32 = vunpack.c.l.bf16 %v1080_v28  ;;  %v1050_v34 = vunpack.c.h.bf16 %v1096_v26  ;;  %v954_v35 = vunpack.c.h.bf16 %v1072_v27  ;;  %v986_v36 = vunpack.c.h.bf16 %v1080_v28  ;;  %v1073_v39 = vld [vmem:[%s1681_s0 + $0x18] sm:$0xff]   ;;  %v1098_v50 = vld [vmem:[%s1681_s0 + $0xe0] sm:$0xff]   ;;  %v1075_v63 = vld [vmem:[%s1681_s0 + $0x28] sm:$0xff]  }
   0x8   :  { %831 = vmatmul.msk.f32.vlgmr.msra.gmra.mxu1 %vm143_vm1, %v977_v8  ;;  %v1081_v40 = vld [vmem:[%s1681_s0 + $0x58] sm:$0xff]   ;;  %v1021_v41 = vunpack.c.l.bf16 %v1089_v37  ;;  %v1053_v42 = vunpack.c.l.bf16 %v1097_v38  ;;  %v957_v43 = vunpack.c.l.bf16 %v1073_v39  ;;  %v1022_v45 = vunpack.c.h.bf16 %v1089_v37  ;;  %v1074_v51 = vld [vmem:[%s1681_s0 + $0x20] sm:$0xff]   ;;  %v1083_v0 = vld [vmem:[%s1681_s0 + $0x68] sm:$0xff]  }
   0x9   :  { %v989_v44 = vunpack.c.l.bf16 %v1081_v40  ;;  %v1054_v46 = vunpack.c.h.bf16 %v1097_v38  ;;  %v958_v47 = vunpack.c.h.bf16 %v1073_v39  ;;  %v990_v48 = vunpack.c.h.bf16 %v1081_v40  ;;  %v1082_v52 = vld [vmem:[%s1681_s0 + $0x60] sm:$0xff]  }
   0xa   :  { %v1025_v53 = vunpack.c.l.bf16 %v1090_v49  ;;  %v1057_v54 = vunpack.c.l.bf16 %v1098_v50  ;;  %v961_v55 = vunpack.c.l.bf16 %v1074_v51  ;;  %v993_v56 = vunpack.c.l.bf16 %v1082_v52 }
   0xb   :  { %v1026_v57 = vunpack.c.h.bf16 %v1090_v49  ;;  %v1058_v58 = vunpack.c.h.bf16 %v1098_v50  ;;  %v962_v59 = vunpack.c.h.bf16 %v1074_v51  ;;  %v994_v60 = vunpack.c.h.bf16 %v1082_v52 }
   0xc   :  { %v1029_v1 = vunpack.c.l.bf16 %v1091_v61  ;;  %v1061_v2 = vunpack.c.l.bf16 %v1099_v62  ;;  %v965_v3 = vunpack.c.l.bf16 %v1075_v63  ;;  %v997_v4 = vunpack.c.l.bf16 %v1083_v0 }
   0xd   :  { %848 = vmatmul.msk.f32.gmra.mxu2 %vm143_vm1, %v1010_v9  ;;  %v1030_v5 = vunpack.c.h.bf16 %v1091_v61  ;;  %v1062_v6 = vunpack.c.h.bf16 %v1099_v62  ;;  %v966_v7 = vunpack.c.h.bf16 %v1075_v63  ;;  %v998_v8 = vunpack.c.h.bf16 %v1083_v0  ;;  %v1092_v9 = vld [vmem:[%s1681_s0 + $0xb0] sm:$0xff]  }
   0xe   :  { %864 = vmatmul.msk.f32.gmra.mxu3 %vm143_vm1, %v1042_v10  ;;  %v1100_v10 = vld [vmem:[%s1681_s0 + $0xf0] sm:$0xff]   ;;  %v1033_v13 = vunpack.c.l.bf16 %v1092_v9 }
   0xf   :  { %816 = vmatmul.msk.f32.gmra.mxu0 %vm143_vm1, %v946_v11  ;;  %v1076_v11 = vld [vmem:[%s1681_s0 + $0x30] sm:$0xff]   ;;  %v1065_v14 = vunpack.c.l.bf16 %v1100_v10 }
  0x10   :  { %832 = vmatmul.msk.f32.gmra.mxu1 %vm143_vm1, %v978_v12  ;;  %v1084_v12 = vld [vmem:[%s1681_s0 + $0x70] sm:$0xff]   ;;  %v969_v15 = vunpack.c.l.bf16 %v1076_v11 }
  0x11   :  { %v1001_v16 = vunpack.c.l.bf16 %v1084_v12 }
  0x15   :  { %849 = vmatmul.msk.f32.gmra.mxu2 %vm143_vm1, %v1013_v17  ;;  %v1034_v17 = vunpack.c.h.bf16 %v1092_v9 }
  0x16   :  { %865 = vmatmul.msk.f32.gmra.mxu3 %vm143_vm1, %v1045_v18  ;;  %v1066_v18 = vunpack.c.h.bf16 %v1100_v10 }
  0x17   :  { %817 = vmatmul.msk.f32.gmra.mxu0 %vm143_vm1, %v949_v19  ;;  %v970_v19 = vunpack.c.h.bf16 %v1076_v11 }
  0x18   :  { %833 = vmatmul.msk.f32.gmra.mxu1 %vm143_vm1, %v981_v20  ;;  %v1002_v20 = vunpack.c.h.bf16 %v1084_v12 }
  0x1d   :  { %850 = vmatmul.msk.f32.gmra.mxu2 %vm143_vm1, %v1014_v21  ;;  %v1093_v21 = vld [vmem:[%s1681_s0 + $0xb8] sm:$0xff]  }
  0x1e   :  { %866 = vmatmul.msk.f32.gmra.mxu3 %vm143_vm1, %v1046_v22  ;;  %v1101_v22 = vld [vmem:[%s1681_s0 + $0xf8] sm:$0xff]   ;;  %v1037_v25 = vunpack.c.l.bf16 %v1093_v21 }
  0x1f   :  { %818 = vmatmul.msk.f32.gmra.mxu0 %vm143_vm1, %v950_v23  ;;  %v1077_v23 = vld [vmem:[%s1681_s0 + $0x38] sm:$0xff]   ;;  %v1069_v26 = vunpack.c.l.bf16 %v1101_v22 }
  0x20   :  { %834 = vmatmul.msk.f32.gmra.mxu1 %vm143_vm1, %v982_v24  ;;  %v1085_v24 = vld [vmem:[%s1681_s0 + $0x78] sm:$0xff]   ;;  %v973_v27 = vunpack.c.l.bf16 %v1077_v23 }
  0x21   :  { %v1005_v28 = vunpack.c.l.bf16 %v1085_v24 }
  0x25   :  { %851 = vmatmul.msk.f32.gmra.mxu2 %vm143_vm1, %v1017_v29  ;;  %v1038_v29 = vunpack.c.h.bf16 %v1093_v21 }
  0x26   :  { %867 = vmatmul.msk.f32.gmra.mxu3 %vm143_vm1, %v1049_v30  ;;  %v1070_v30 = vunpack.c.h.bf16 %v1101_v22 }
  0x27   :  { %819 = vmatmul.msk.f32.gmra.mxu0 %vm143_vm1, %v953_v31  ;;  %v974_v31 = vunpack.c.h.bf16 %v1077_v23 }
  0x28   :  { %835 = vmatmul.msk.f32.gmra.mxu1 %vm143_vm1, %v985_v32  ;;  %v1006_v32 = vunpack.c.h.bf16 %v1085_v24 }
  0x2d   :  { %852 = vmatmul.msk.f32.gmra.mxu2 %vm143_vm1, %v1018_v33  ;;  %v1294_v33 = vld [vmem:[%s1682_s2] ss:$0 sm:$0xff] }
  0x2e   :  { %868 = vmatmul.msk.f32.gmra.mxu3 %vm143_vm1, %v1050_v34 }
  0x2f   :  { %820 = vmatmul.msk.f32.gmra.mxu0 %vm143_vm1, %v954_v35 }
  0x30   :  { %836 = vmatmul.msk.f32.gmra.mxu1 %vm143_vm1, %v986_v36  ;;  %v1107_v36 = vmov 0.0  }
  0x35   :  { %853 = vmatmul.msk.f32.gmra.mxu2 %vm143_vm1, %v1021_v41 }
  0x36   :  { %869 = vmatmul.msk.f32.gmra.mxu3 %vm143_vm1, %v1053_v42 }
  0x37   :  { %821 = vmatmul.msk.f32.gmra.mxu0 %vm143_vm1, %v957_v43 }
  0x38   :  { %837 = vmatmul.msk.f32.gmra.mxu1 %vm143_vm1, %v989_v44 }
  0x3d   :  { %854 = vmatmul.msk.f32.gmra.mxu2 %vm143_vm1, %v1022_v45 }
  0x3e   :  { %870 = vmatmul.msk.f32.gmra.mxu3 %vm143_vm1, %v1054_v46 }
  0x3f   :  { %822 = vmatmul.msk.f32.gmra.mxu0 %vm143_vm1, %v958_v47 }
  0x40   :  { %838 = vmatmul.msk.f32.gmra.mxu1 %vm143_vm1, %v990_v48 }
  0x45   :  { %855 = vmatmul.msk.f32.gmra.mxu2 %vm143_vm1, %v1025_v53 }
  0x46   :  { %871 = vmatmul.msk.f32.gmra.mxu3 %vm143_vm1, %v1057_v54 }
  0x47   :  { %823 = vmatmul.msk.f32.gmra.mxu0 %vm143_vm1, %v961_v55 }
  0x48   :  { %839 = vmatmul.msk.f32.gmra.mxu1 %vm143_vm1, %v993_v56 }
  0x4d   :  { %856 = vmatmul.msk.f32.gmra.mxu2 %vm143_vm1, %v1026_v57 }
  0x4e   :  { %872 = vmatmul.msk.f32.gmra.mxu3 %vm143_vm1, %v1058_v58 }
  0x4f   :  { %824 = vmatmul.msk.f32.gmra.mxu0 %vm143_vm1, %v962_v59 }
  0x50   :  { %840 = vmatmul.msk.f32.gmra.mxu1 %vm143_vm1, %v994_v60 }
  0x55   :  { %857 = vmatmul.msk.f32.gmra.mxu2 %vm143_vm1, %v1029_v1 }
  0x56   :  { %873 = vmatmul.msk.f32.gmra.mxu3 %vm143_vm1, %v1061_v2 }
  0x57   :  { %825 = vmatmul.msk.f32.gmra.mxu0 %vm143_vm1, %v965_v3 }
  0x58   :  { %841 = vmatmul.msk.f32.gmra.mxu1 %vm143_vm1, %v997_v4 }
  0x5d   :  { %858 = vmatmul.msk.f32.gmra.mxu2 %vm143_vm1, %v1030_v5 }
  0x5e   :  { %874 = vmatmul.msk.f32.gmra.mxu3 %vm143_vm1, %v1062_v6 }
  0x5f   :  { %826 = vmatmul.msk.f32.gmra.mxu0 %vm143_vm1, %v966_v7 }
  0x60   :  { %842 = vmatmul.msk.f32.gmra.mxu1 %vm143_vm1, %v998_v8 }
  0x65   :  { %859 = vmatmul.msk.f32.gmra.mxu2 %vm143_vm1, %v1033_v13 }
  0x66   :  { %875 = vmatmul.msk.f32.gmra.mxu3 %vm143_vm1, %v1065_v14 }
  0x67   :  { %827 = vmatmul.msk.f32.gmra.mxu0 %vm143_vm1, %v969_v15 }
  0x68   :  { %843 = vmatmul.msk.f32.gmra.mxu1 %vm143_vm1, %v1001_v16 }
  0x6d   :  { %860 = vmatmul.msk.f32.gmra.mxu2 %vm143_vm1, %v1034_v17 }
  0x6e   :  { %876 = vmatmul.msk.f32.gmra.mxu3 %vm143_vm1, %v1066_v18 }
  0x6f   :  { %828 = vmatmul.msk.f32.gmra.mxu0 %vm143_vm1, %v970_v19 }
  0x70   :  { %844 = vmatmul.msk.f32.gmra.mxu1 %vm143_vm1, %v1002_v20 }
  0x75   :  { %861 = vmatmul.msk.f32.gmra.mxu2 %vm143_vm1, %v1037_v25 }
  0x76   :  { %877 = vmatmul.msk.f32.gmra.mxu3 %vm143_vm1, %v1069_v26 }
  0x77   :  { %829 = vmatmul.msk.f32.gmra.mxu0 %vm143_vm1, %v973_v27 }
  0x78   :  { %845 = vmatmul.msk.f32.gmra.mxu1 %vm143_vm1, %v1005_v28 }
  0x7d   :  { %862 = vmatmul.msk.f32.gmra.mxu2 %vm143_vm1, %v1038_v29 }
  0x7e   :  { %878 = vmatmul.msk.f32.gmra.mxu3 %vm143_vm1, %v1070_v30 }
  0x7f   :  { %830 = vmatmul.msk.f32.gmra.mxu0 %vm143_vm1, %v974_v31 }
  0x80   :  { %846 = vmatmul.msk.f32.gmra.mxu1 %vm143_vm1, %v1006_v32 }
  0x84   :  { %v357_v34 = vpop.f32.mrf.mxu0 }
  0x85   :  { %v405_v35 = vpop.f32.mrf.mxu1  ;;  %vm553_vm3 = vcmp.ge.f32.partialorder %v357_v34, %v1294_v33 }
  0x86   :  { %vm569_vm4 = vcmp.ge.f32.partialorder %v405_v35, %v1294_v33  ;;  %v879_v37 = vsel %vm553_vm3, 1.0, %v1107_v36 }
  0x87   :  { %v895_v38 = vsel %vm569_vm4, 1.0, %v1107_v36  ;;  %746 = vst.msk [vmem:[%s1683_s3] sm:$0xff] %vm745_vm2, %v879_v37 }
  0x88   :  { %762 = vst.msk [vmem:[%s1683_s3 + $0x80] sm:$0xff] %vm745_vm2, %v895_v38  ;;  %v453_v39 = vpop.f32.mrf.mxu2 }
  0x89   :  { %v501_v40 = vpop.f32.mrf.mxu3  ;;  %vm585_vm5 = vcmp.ge.f32.partialorder %v453_v39, %v1294_v33 }
  0x8a   :  { %vm601_vm6 = vcmp.ge.f32.partialorder %v501_v40, %v1294_v33  ;;  %v911_v41 = vsel %vm585_vm5, 1.0, %v1107_v36 }
  0x8b   :  { %v927_v42 = vsel %vm601_vm6, 1.0, %v1107_v36  ;;  %778 = vst.msk [vmem:[%s1683_s3 + $0x100] sm:$0xff] %vm745_vm2, %v911_v41 }
  0x8c   :  { %v360_v43 = vpop.f32.mrf.mxu0  ;;  %794 = vst.msk [vmem:[%s1683_s3 + $0x180] sm:$0xff] %vm745_vm2, %v927_v42 }
  0x8d   :  { %v408_v44 = vpop.f32.mrf.mxu1  ;;  %vm554_vm7 = vcmp.ge.f32.partialorder %v360_v43, %v1294_v33 }
  0x8e   :  { %vm570_vm8 = vcmp.ge.f32.partialorder %v408_v44, %v1294_v33  ;;  %v880_v45 = vsel %vm554_vm7, 1.0, %v1107_v36 }
  0x8f   :  { %v896_v46 = vsel %vm570_vm8, 1.0, %v1107_v36  ;;  %747 = vst.msk [vmem:[%s1683_s3 + $0x8] sm:$0xff] %vm745_vm2, %v880_v45 }
  0x90   :  { %763 = vst.msk [vmem:[%s1683_s3 + $0x88] sm:$0xff] %vm745_vm2, %v896_v46  ;;  %v456_v47 = vpop.f32.mrf.mxu2 }
  0x91   :  { %v504_v48 = vpop.f32.mrf.mxu3  ;;  %vm586_vm9 = vcmp.ge.f32.partialorder %v456_v47, %v1294_v33 }
  0x92   :  { %vm602_vm10 = vcmp.ge.f32.partialorder %v504_v48, %v1294_v33  ;;  %v912_v49 = vsel %vm586_vm9, 1.0, %v1107_v36 }
  0x93   :  { %v928_v50 = vsel %vm602_vm10, 1.0, %v1107_v36  ;;  %779 = vst.msk [vmem:[%s1683_s3 + $0x108] sm:$0xff] %vm745_vm2, %v912_v49 }
  0x94   :  { %v363_v51 = vpop.f32.mrf.mxu0  ;;  %795 = vst.msk [vmem:[%s1683_s3 + $0x188] sm:$0xff] %vm745_vm2, %v928_v50 }
  0x95   :  { %v411_v52 = vpop.f32.mrf.mxu1  ;;  %vm555_vm11 = vcmp.ge.f32.partialorder %v363_v51, %v1294_v33 }
  0x96   :  { %vm571_vm12 = vcmp.ge.f32.partialorder %v411_v52, %v1294_v33  ;;  %v881_v53 = vsel %vm555_vm11, 1.0, %v1107_v36 }
  0x97   :  { %v897_v54 = vsel %vm571_vm12, 1.0, %v1107_v36  ;;  %748 = vst.msk [vmem:[%s1683_s3 + $0x10] sm:$0xff] %vm745_vm2, %v881_v53 }
  0x98   :  { %764 = vst.msk [vmem:[%s1683_s3 + $0x90] sm:$0xff] %vm745_vm2, %v897_v54  ;;  %v459_v55 = vpop.f32.mrf.mxu2 }
  0x99   :  { %v507_v56 = vpop.f32.mrf.mxu3  ;;  %vm587_vm13 = vcmp.ge.f32.partialorder %v459_v55, %v1294_v33 }
  0x9a   :  { %vm603_vm14 = vcmp.ge.f32.partialorder %v507_v56, %v1294_v33  ;;  %v913_v57 = vsel %vm587_vm13, 1.0, %v1107_v36 }
  0x9b   :  { %v929_v58 = vsel %vm603_vm14, 1.0, %v1107_v36  ;;  %780 = vst.msk [vmem:[%s1683_s3 + $0x110] sm:$0xff] %vm745_vm2, %v913_v57 }
  0x9c   :  { %v366_v59 = vpop.f32.mrf.mxu0  ;;  %796 = vst.msk [vmem:[%s1683_s3 + $0x190] sm:$0xff] %vm745_vm2, %v929_v58 }
  0x9d   :  { %v414_v60 = vpop.f32.mrf.mxu1  ;;  %vm556_vm15 = vcmp.ge.f32.partialorder %v366_v59, %v1294_v33 }
  0x9e   :  { %vm572_vm0 = vcmp.ge.f32.partialorder %v414_v60, %v1294_v33  ;;  %v882_v61 = vsel %vm556_vm15, 1.0, %v1107_v36 }
  0x9f   :  { %v898_v62 = vsel %vm572_vm0, 1.0, %v1107_v36  ;;  %749 = vst.msk [vmem:[%s1683_s3 + $0x18] sm:$0xff] %vm745_vm2, %v882_v61 }
  0xa0   :  { %765 = vst.msk [vmem:[%s1683_s3 + $0x98] sm:$0xff] %vm745_vm2, %v898_v62  ;;  %v462_v63 = vpop.f32.mrf.mxu2 }
  0xa1   :  { %v510_v0 = vpop.f32.mrf.mxu3  ;;  %vm588_vm1 = vcmp.ge.f32.partialorder %v462_v63, %v1294_v33 }
  0xa2   :  { %vm604_vm3 = vcmp.ge.f32.partialorder %v510_v0, %v1294_v33  ;;  %v914_v1 = vsel %vm588_vm1, 1.0, %v1107_v36 }
  0xa3   :  { %v930_v2 = vsel %vm604_vm3, 1.0, %v1107_v36  ;;  %781 = vst.msk [vmem:[%s1683_s3 + $0x118] sm:$0xff] %vm745_vm2, %v914_v1 }
  0xa4   :  { %v369_v3 = vpop.f32.mrf.mxu0  ;;  %797 = vst.msk [vmem:[%s1683_s3 + $0x198] sm:$0xff] %vm745_vm2, %v930_v2 }
  0xa5   :  { %v417_v4 = vpop.f32.mrf.mxu1  ;;  %vm557_vm4 = vcmp.ge.f32.partialorder %v369_v3, %v1294_v33 }
  0xa6   :  { %vm573_vm5 = vcmp.ge.f32.partialorder %v417_v4, %v1294_v33  ;;  %v883_v5 = vsel %vm557_vm4, 1.0, %v1107_v36 }
  0xa7   :  { %v899_v6 = vsel %vm573_vm5, 1.0, %v1107_v36  ;;  %750 = vst.msk [vmem:[%s1683_s3 + $0x20] sm:$0xff] %vm745_vm2, %v883_v5 }
  0xa8   :  { %766 = vst.msk [vmem:[%s1683_s3 + $0xa0] sm:$0xff] %vm745_vm2, %v899_v6  ;;  %v465_v7 = vpop.f32.mrf.mxu2 }
  0xa9   :  { %v513_v8 = vpop.f32.mrf.mxu3  ;;  %vm589_vm6 = vcmp.ge.f32.partialorder %v465_v7, %v1294_v33 }
  0xaa   :  { %vm605_vm7 = vcmp.ge.f32.partialorder %v513_v8, %v1294_v33  ;;  %v915_v9 = vsel %vm589_vm6, 1.0, %v1107_v36 }
  0xab   :  { %v931_v10 = vsel %vm605_vm7, 1.0, %v1107_v36  ;;  %782 = vst.msk [vmem:[%s1683_s3 + $0x120] sm:$0xff] %vm745_vm2, %v915_v9 }
  0xac   :  { %v372_v11 = vpop.f32.mrf.mxu0  ;;  %798 = vst.msk [vmem:[%s1683_s3 + $0x1a0] sm:$0xff] %vm745_vm2, %v931_v10 }
  0xad   :  { %v420_v12 = vpop.f32.mrf.mxu1  ;;  %vm558_vm8 = vcmp.ge.f32.partialorder %v372_v11, %v1294_v33 }
  0xae   :  { %vm574_vm9 = vcmp.ge.f32.partialorder %v420_v12, %v1294_v33  ;;  %v884_v13 = vsel %vm558_vm8, 1.0, %v1107_v36 }
  0xaf   :  { %v900_v14 = vsel %vm574_vm9, 1.0, %v1107_v36  ;;  %751 = vst.msk [vmem:[%s1683_s3 + $0x28] sm:$0xff] %vm745_vm2, %v884_v13 }
  0xb0   :  { %767 = vst.msk [vmem:[%s1683_s3 + $0xa8] sm:$0xff] %vm745_vm2, %v900_v14  ;;  %v468_v15 = vpop.f32.mrf.mxu2 }
  0xb1   :  { %v516_v16 = vpop.f32.mrf.mxu3  ;;  %vm590_vm10 = vcmp.ge.f32.partialorder %v468_v15, %v1294_v33 }
  0xb2   :  { %vm606_vm11 = vcmp.ge.f32.partialorder %v516_v16, %v1294_v33  ;;  %v916_v17 = vsel %vm590_vm10, 1.0, %v1107_v36 }
  0xb3   :  { %v932_v18 = vsel %vm606_vm11, 1.0, %v1107_v36  ;;  %783 = vst.msk [vmem:[%s1683_s3 + $0x128] sm:$0xff] %vm745_vm2, %v916_v17 }
  0xb4   :  { %v375_v19 = vpop.f32.mrf.mxu0  ;;  %799 = vst.msk [vmem:[%s1683_s3 + $0x1a8] sm:$0xff] %vm745_vm2, %v932_v18 }
  0xb5   :  { %v423_v20 = vpop.f32.mrf.mxu1  ;;  %vm559_vm12 = vcmp.ge.f32.partialorder %v375_v19, %v1294_v33 }
  0xb6   :  { %vm575_vm13 = vcmp.ge.f32.partialorder %v423_v20, %v1294_v33  ;;  %v885_v21 = vsel %vm559_vm12, 1.0, %v1107_v36 }
  0xb7   :  { %v901_v22 = vsel %vm575_vm13, 1.0, %v1107_v36  ;;  %752 = vst.msk [vmem:[%s1683_s3 + $0x30] sm:$0xff] %vm745_vm2, %v885_v21 }
  0xb8   :  { %768 = vst.msk [vmem:[%s1683_s3 + $0xb0] sm:$0xff] %vm745_vm2, %v901_v22  ;;  %v471_v23 = vpop.f32.mrf.mxu2 }
  0xb9   :  { %v519_v24 = vpop.f32.mrf.mxu3  ;;  %vm591_vm14 = vcmp.ge.f32.partialorder %v471_v23, %v1294_v33 }
  0xba   :  { %vm607_vm15 = vcmp.ge.f32.partialorder %v519_v24, %v1294_v33  ;;  %v917_v25 = vsel %vm591_vm14, 1.0, %v1107_v36 }
  0xbb   :  { %v933_v26 = vsel %vm607_vm15, 1.0, %v1107_v36  ;;  %784 = vst.msk [vmem:[%s1683_s3 + $0x130] sm:$0xff] %vm745_vm2, %v917_v25 }
  0xbc   :  { %v378_v27 = vpop.f32.mrf.mxu0  ;;  %800 = vst.msk [vmem:[%s1683_s3 + $0x1b0] sm:$0xff] %vm745_vm2, %v933_v26 }
  0xbd   :  { %v426_v28 = vpop.f32.mrf.mxu1  ;;  %vm560_vm0 = vcmp.ge.f32.partialorder %v378_v27, %v1294_v33 }
  0xbe   :  { %vm576_vm1 = vcmp.ge.f32.partialorder %v426_v28, %v1294_v33  ;;  %v886_v29 = vsel %vm560_vm0, 1.0, %v1107_v36 }
  0xbf   :  { %v902_v30 = vsel %vm576_vm1, 1.0, %v1107_v36  ;;  %753 = vst.msk [vmem:[%s1683_s3 + $0x38] sm:$0xff] %vm745_vm2, %v886_v29 }
  0xc0   :  { %769 = vst.msk [vmem:[%s1683_s3 + $0xb8] sm:$0xff] %vm745_vm2, %v902_v30  ;;  %v474_v31 = vpop.f32.mrf.mxu2 }
  0xc1   :  { %v522_v32 = vpop.f32.mrf.mxu3  ;;  %vm592_vm3 = vcmp.ge.f32.partialorder %v474_v31, %v1294_v33 }
  0xc2   :  { %vm608_vm4 = vcmp.ge.f32.partialorder %v522_v32, %v1294_v33  ;;  %v918_v34 = vsel %vm592_vm3, 1.0, %v1107_v36 }
  0xc3   :  { %v934_v35 = vsel %vm608_vm4, 1.0, %v1107_v36  ;;  %785 = vst.msk [vmem:[%s1683_s3 + $0x138] sm:$0xff] %vm745_vm2, %v918_v34 }
  0xc4   :  { %v381_v37 = vpop.f32.mrf.mxu0  ;;  %801 = vst.msk [vmem:[%s1683_s3 + $0x1b8] sm:$0xff] %vm745_vm2, %v934_v35 }
  0xc5   :  { %v429_v38 = vpop.f32.mrf.mxu1  ;;  %vm561_vm5 = vcmp.ge.f32.partialorder %v381_v37, %v1294_v33 }
  0xc6   :  { %vm577_vm6 = vcmp.ge.f32.partialorder %v429_v38, %v1294_v33  ;;  %v887_v39 = vsel %vm561_vm5, 1.0, %v1107_v36 }
  0xc7   :  { %v903_v40 = vsel %vm577_vm6, 1.0, %v1107_v36  ;;  %754 = vst.msk [vmem:[%s1683_s3 + $0x40] sm:$0xff] %vm745_vm2, %v887_v39 }
  0xc8   :  { %770 = vst.msk [vmem:[%s1683_s3 + $0xc0] sm:$0xff] %vm745_vm2, %v903_v40  ;;  %v477_v41 = vpop.f32.mrf.mxu2 }
  0xc9   :  { %v525_v42 = vpop.f32.mrf.mxu3  ;;  %vm593_vm7 = vcmp.ge.f32.partialorder %v477_v41, %v1294_v33 }
  0xca   :  { %vm609_vm8 = vcmp.ge.f32.partialorder %v525_v42, %v1294_v33  ;;  %v919_v43 = vsel %vm593_vm7, 1.0, %v1107_v36 }
  0xcb   :  { %v935_v44 = vsel %vm609_vm8, 1.0, %v1107_v36  ;;  %786 = vst.msk [vmem:[%s1683_s3 + $0x140] sm:$0xff] %vm745_vm2, %v919_v43 }
  0xcc   :  { %v384_v45 = vpop.f32.mrf.mxu0  ;;  %802 = vst.msk [vmem:[%s1683_s3 + $0x1c0] sm:$0xff] %vm745_vm2, %v935_v44 }
  0xcd   :  { %v432_v46 = vpop.f32.mrf.mxu1  ;;  %vm562_vm9 = vcmp.ge.f32.partialorder %v384_v45, %v1294_v33 }
  0xce   :  { %vm578_vm10 = vcmp.ge.f32.partialorder %v432_v46, %v1294_v33  ;;  %v888_v47 = vsel %vm562_vm9, 1.0, %v1107_v36 }
  0xcf   :  { %v904_v48 = vsel %vm578_vm10, 1.0, %v1107_v36  ;;  %755 = vst.msk [vmem:[%s1683_s3 + $0x48] sm:$0xff] %vm745_vm2, %v888_v47 }
  0xd0   :  { %771 = vst.msk [vmem:[%s1683_s3 + $0xc8] sm:$0xff] %vm745_vm2, %v904_v48  ;;  %v480_v49 = vpop.f32.mrf.mxu2 }
  0xd1   :  { %v528_v50 = vpop.f32.mrf.mxu3  ;;  %vm594_vm11 = vcmp.ge.f32.partialorder %v480_v49, %v1294_v33 }
  0xd2   :  { %vm610_vm12 = vcmp.ge.f32.partialorder %v528_v50, %v1294_v33  ;;  %v920_v51 = vsel %vm594_vm11, 1.0, %v1107_v36 }
  0xd3   :  { %v936_v52 = vsel %vm610_vm12, 1.0, %v1107_v36  ;;  %787 = vst.msk [vmem:[%s1683_s3 + $0x148] sm:$0xff] %vm745_vm2, %v920_v51 }
  0xd4   :  { %v387_v53 = vpop.f32.mrf.mxu0  ;;  %803 = vst.msk [vmem:[%s1683_s3 + $0x1c8] sm:$0xff] %vm745_vm2, %v936_v52 }
  0xd5   :  { %v435_v54 = vpop.f32.mrf.mxu1  ;;  %vm563_vm13 = vcmp.ge.f32.partialorder %v387_v53, %v1294_v33 }
  0xd6   :  { %vm579_vm14 = vcmp.ge.f32.partialorder %v435_v54, %v1294_v33  ;;  %v889_v55 = vsel %vm563_vm13, 1.0, %v1107_v36 }
  0xd7   :  { %v905_v56 = vsel %vm579_vm14, 1.0, %v1107_v36  ;;  %756 = vst.msk [vmem:[%s1683_s3 + $0x50] sm:$0xff] %vm745_vm2, %v889_v55 }
  0xd8   :  { %772 = vst.msk [vmem:[%s1683_s3 + $0xd0] sm:$0xff] %vm745_vm2, %v905_v56  ;;  %v483_v57 = vpop.f32.mrf.mxu2 }
  0xd9   :  { %v531_v58 = vpop.f32.mrf.mxu3  ;;  %vm595_vm15 = vcmp.ge.f32.partialorder %v483_v57, %v1294_v33 }
  0xda   :  { %vm611_vm0 = vcmp.ge.f32.partialorder %v531_v58, %v1294_v33  ;;  %v921_v59 = vsel %vm595_vm15, 1.0, %v1107_v36 }
  0xdb   :  { %v937_v60 = vsel %vm611_vm0, 1.0, %v1107_v36  ;;  %788 = vst.msk [vmem:[%s1683_s3 + $0x150] sm:$0xff] %vm745_vm2, %v921_v59 }
  0xdc   :  { %v390_v61 = vpop.f32.mrf.mxu0  ;;  %804 = vst.msk [vmem:[%s1683_s3 + $0x1d0] sm:$0xff] %vm745_vm2, %v937_v60 }
  0xdd   :  { %v438_v62 = vpop.f32.mrf.mxu1  ;;  %vm564_vm1 = vcmp.ge.f32.partialorder %v390_v61, %v1294_v33 }
  0xde   :  { %vm580_vm3 = vcmp.ge.f32.partialorder %v438_v62, %v1294_v33  ;;  %v890_v63 = vsel %vm564_vm1, 1.0, %v1107_v36 }
  0xdf   :  { %v906_v0 = vsel %vm580_vm3, 1.0, %v1107_v36  ;;  %757 = vst.msk [vmem:[%s1683_s3 + $0x58] sm:$0xff] %vm745_vm2, %v890_v63 }
  0xe0   :  { %773 = vst.msk [vmem:[%s1683_s3 + $0xd8] sm:$0xff] %vm745_vm2, %v906_v0  ;;  %v486_v1 = vpop.f32.mrf.mxu2 }
  0xe1   :  { %v534_v2 = vpop.f32.mrf.mxu3  ;;  %vm596_vm4 = vcmp.ge.f32.partialorder %v486_v1, %v1294_v33 }
  0xe2   :  { %vm612_vm5 = vcmp.ge.f32.partialorder %v534_v2, %v1294_v33  ;;  %v922_v3 = vsel %vm596_vm4, 1.0, %v1107_v36 }
  0xe3   :  { %v938_v4 = vsel %vm612_vm5, 1.0, %v1107_v36  ;;  %789 = vst.msk [vmem:[%s1683_s3 + $0x158] sm:$0xff] %vm745_vm2, %v922_v3 }
  0xe4   :  { %v393_v5 = vpop.f32.mrf.mxu0  ;;  %805 = vst.msk [vmem:[%s1683_s3 + $0x1d8] sm:$0xff] %vm745_vm2, %v938_v4 }
  0xe5   :  { %v441_v6 = vpop.f32.mrf.mxu1  ;;  %vm565_vm6 = vcmp.ge.f32.partialorder %v393_v5, %v1294_v33 }
  0xe6   :  { %vm581_vm7 = vcmp.ge.f32.partialorder %v441_v6, %v1294_v33  ;;  %v891_v7 = vsel %vm565_vm6, 1.0, %v1107_v36 }
  0xe7   :  { %v907_v8 = vsel %vm581_vm7, 1.0, %v1107_v36  ;;  %758 = vst.msk [vmem:[%s1683_s3 + $0x60] sm:$0xff] %vm745_vm2, %v891_v7 }
  0xe8   :  { %774 = vst.msk [vmem:[%s1683_s3 + $0xe0] sm:$0xff] %vm745_vm2, %v907_v8  ;;  %v489_v9 = vpop.f32.mrf.mxu2 }
  0xe9   :  { %v537_v10 = vpop.f32.mrf.mxu3  ;;  %vm597_vm8 = vcmp.ge.f32.partialorder %v489_v9, %v1294_v33 }
  0xea   :  { %vm613_vm9 = vcmp.ge.f32.partialorder %v537_v10, %v1294_v33  ;;  %v923_v11 = vsel %vm597_vm8, 1.0, %v1107_v36 }
  0xeb   :  { %v939_v12 = vsel %vm613_vm9, 1.0, %v1107_v36  ;;  %790 = vst.msk [vmem:[%s1683_s3 + $0x160] sm:$0xff] %vm745_vm2, %v923_v11 }
  0xec   :  { %v396_v13 = vpop.f32.mrf.mxu0  ;;  %806 = vst.msk [vmem:[%s1683_s3 + $0x1e0] sm:$0xff] %vm745_vm2, %v939_v12 }
  0xed   :  { %v444_v14 = vpop.f32.mrf.mxu1  ;;  %vm566_vm10 = vcmp.ge.f32.partialorder %v396_v13, %v1294_v33 }
  0xee   :  { %vm582_vm11 = vcmp.ge.f32.partialorder %v444_v14, %v1294_v33  ;;  %v892_v15 = vsel %vm566_vm10, 1.0, %v1107_v36 }
  0xef   :  { %v908_v16 = vsel %vm582_vm11, 1.0, %v1107_v36  ;;  %759 = vst.msk [vmem:[%s1683_s3 + $0x68] sm:$0xff] %vm745_vm2, %v892_v15 }
  0xf0   :  { %775 = vst.msk [vmem:[%s1683_s3 + $0xe8] sm:$0xff] %vm745_vm2, %v908_v16  ;;  %v492_v17 = vpop.f32.mrf.mxu2 }
  0xf1   :  { %v540_v18 = vpop.f32.mrf.mxu3  ;;  %vm598_vm12 = vcmp.ge.f32.partialorder %v492_v17, %v1294_v33 }
  0xf2   :  { %vm614_vm13 = vcmp.ge.f32.partialorder %v540_v18, %v1294_v33  ;;  %v924_v19 = vsel %vm598_vm12, 1.0, %v1107_v36 }
  0xf3   :  { %v940_v20 = vsel %vm614_vm13, 1.0, %v1107_v36  ;;  %791 = vst.msk [vmem:[%s1683_s3 + $0x168] sm:$0xff] %vm745_vm2, %v924_v19 }
  0xf4   :  { %v399_v21 = vpop.f32.mrf.mxu0  ;;  %807 = vst.msk [vmem:[%s1683_s3 + $0x1e8] sm:$0xff] %vm745_vm2, %v940_v20 }
  0xf5   :  { %v447_v22 = vpop.f32.mrf.mxu1  ;;  %vm567_vm14 = vcmp.ge.f32.partialorder %v399_v21, %v1294_v33 }
  0xf6   :  { %vm583_vm15 = vcmp.ge.f32.partialorder %v447_v22, %v1294_v33  ;;  %v893_v23 = vsel %vm567_vm14, 1.0, %v1107_v36 }
  0xf7   :  { %v909_v24 = vsel %vm583_vm15, 1.0, %v1107_v36  ;;  %760 = vst.msk [vmem:[%s1683_s3 + $0x70] sm:$0xff] %vm745_vm2, %v893_v23 }
  0xf8   :  { %776 = vst.msk [vmem:[%s1683_s3 + $0xf0] sm:$0xff] %vm745_vm2, %v909_v24  ;;  %v495_v25 = vpop.f32.mrf.mxu2 }
  0xf9   :  { %v543_v26 = vpop.f32.mrf.mxu3  ;;  %vm599_vm0 = vcmp.ge.f32.partialorder %v495_v25, %v1294_v33 }
  0xfa   :  { %vm615_vm1 = vcmp.ge.f32.partialorder %v543_v26, %v1294_v33  ;;  %v925_v27 = vsel %vm599_vm0, 1.0, %v1107_v36 }
  0xfb   :  { %v941_v28 = vsel %vm615_vm1, 1.0, %v1107_v36  ;;  %792 = vst.msk [vmem:[%s1683_s3 + $0x170] sm:$0xff] %vm745_vm2, %v925_v27 }
  0xfc   :  { %v402_v29 = vpop.f32.mrf.mxu0  ;;  %808 = vst.msk [vmem:[%s1683_s3 + $0x1f0] sm:$0xff] %vm745_vm2, %v941_v28 }
  0xfd   :  { %v450_v30 = vpop.f32.mrf.mxu1  ;;  %vm568_vm3 = vcmp.ge.f32.partialorder %v402_v29, %v1294_v33 }
  0xfe   :  { %vm584_vm4 = vcmp.ge.f32.partialorder %v450_v30, %v1294_v33  ;;  %v894_v31 = vsel %vm568_vm3, 1.0, %v1107_v36 }
  0xff   :  { %v910_v32 = vsel %vm584_vm4, 1.0, %v1107_v36  ;;  %761 = vst.msk [vmem:[%s1683_s3 + $0x78] sm:$0xff] %vm745_vm2, %v894_v31 }
 0x100   :  { %777 = vst.msk [vmem:[%s1683_s3 + $0xf8] sm:$0xff] %vm745_vm2, %v910_v32  ;;  %v498_v34 = vpop.f32.mrf.mxu2 }
 0x101   :  { %v546_v35 = vpop.f32.mrf.mxu3  ;;  %vm600_vm5 = vcmp.ge.f32.partialorder %v498_v34, %v1294_v33 }
 0x102   :  { %vm616_vm6 = vcmp.ge.f32.partialorder %v546_v35, %v1294_v33  ;;  %v926_v37 = vsel %vm600_vm5, 1.0, %v1107_v36 }
 0x103   :  { %v942_v38 = vsel %vm616_vm6, 1.0, %v1107_v36  ;;  %793 = vst.msk [vmem:[%s1683_s3 + $0x178] sm:$0xff] %vm745_vm2, %v926_v37 }
 0x104   :  { %809 = vst.msk [vmem:[%s1683_s3 + $0x1f8] sm:$0xff] %vm745_vm2, %v942_v38 }

// kernel: dwconv_snn.2
= control target key start
LH: loop header
LB: loop body
LE: loop exit
PB: predicated region body
PF: predicated region fallthrough
CT: control target
= control target key end

     0   :  { %s2328_s12 = smov 0   ;;  %s2330_s13 = smov 0   ;;  %s3719_s0 = inlined_call_operand.vmem [shape: f32[2,18,18,4], index: 0, kind: input, shape index: {}]   ;;  %s3720_s1 = inlined_call_operand.vmem [shape: f32[3,3,4], index: 1, kind: input, shape index: {}]   ;;  %s3721_s2 = inlined_call_operand.vmem [shape: f32[1,4], index: 2, kind: input, shape index: {}]   ;;  %s3722_s3 = inlined_call_operand.vmem [shape: bf16[2,16,16,4], index: 3, kind: output, shape index: {}]  }
   0x1   :  { %s2332_s14 = smov 0  }
   0x2 LB: > { %s25_s15 = sadd.s32 1, %s2301_s13  ;;  %p2215_p0 = scmp.ge.s32.totalorder %s2305_s14, 1  ;;  %s2305_s14 = sphi %s2332_s14, %s13_s14   ;;  %s2301_s13 = sphi %s2330_s13, %s3724_s13   ;;  %s2297_s12 = sphi %s2328_s12, %s3723_s12  }
   0x3   : > { %p27_p1 = scmp.ge.s32.totalorder %s25_s15, 2  ;;  %p173_p2 = scmp.lt.s32.totalorder %s2305_s14, 3 }
   0x5   : > { %s3726_s15 = smov (%p27_p1, %s25_s15), 0  ;;  %p174_p3 = pnand %p2215_p0, %p173_p2 }
   0x6   : > { %p210_p4 = scmp.lt.s32.totalorder (!%p174_p3), %s2297_s12, 1 }
   0x7   : > { %177 = sbr.rel (%p174_p3) target bundleno = 335 (0x14f), region = 32 }
   0xc   : > { %v287_v0 = vld [vmem:[%s3720_s1] sm:$0x7]  ;;  %s3728_s12 = smov (!%p210_p4, %s2297_s12), 1  ;;  %v288_v1 = vld [vmem:[%s3720_s1 + $0x4] sm:$0x7]  ;;  %vm452_vm0 = vcmask 1046528  }
   0xd   : > { %s2254_s20 = smul.u32 432, %s3728_s12  ;;  %v289_v2 = vld [vmem:[%s3720_s1 + $0x8] sm:$0x7]  ;;  %v2358_v3 = vperm.slane %v287_v0, 0  ;;  %v2360_v4 = vperm.slane %v287_v0, 1  ;;  %v2362_v5 = vperm.slane %v287_v0, 2 }
   0xe   : > { %v2364_v6 = vperm.slane %v288_v1, 0  ;;  %v2366_v7 = vperm.slane %v288_v1, 1  ;;  %vm694_vm1 = vcmask 1045504   ;;  %v2373_v8 = vperm.slane %v288_v1, 2  ;;  %s2253_s28 = sshll.u32 %s3728_s12, 7 }
   0xf   : > { %s2371_s25 = scalar_lea.vmem %s3719_s0, %s2254_s20  ;;  %v2377_v11 = vperm.slane %v289_v2, 0  ;;  %v2379_v12 = vperm.slane %v289_v2, 1  ;;  %v2381_v13 = vperm.slane %v289_v2, 2  ;;  %vm2065_vm2 = vcmask 27648   ;;  %s2495_s4 = scalar_lea.vmem %s3722_s3, %s2253_s28 }
  0x10   : > { %v233_v9 = vld [vmem:[%s2371_s25] sm:$0xff]  ;;  %v234_v10 = vld [vmem:[%s2371_s25 + $0x8] sm:$0xff]  ;;  %v2384_v14 = vld [vmem:[%s2371_s25 + $0x18] sm:$0xff] }
  0x11   : > { %v2387_v15 = vld [vmem:[%s2371_s25 + $0x20] sm:$0xff]  ;;  %v291_v16 = vmul.f32 %v2358_v3, %v233_v9  ;;  %v356_v17 = vmul.f32 %v2360_v4, %v233_v9  ;;  %v357_v18 = vmul.f32 %v2360_v4, %v234_v10  ;;  %v598_v19 = vmul.f32 %v2362_v5, %v233_v9  ;;  %v2403_v28 = vld [vmem:[%s2371_s25 + $0x30] sm:$0xff]  ;;  %v2414_v38 = vld [vmem:[%s2371_s25 + $0x38] sm:$0xff] }
  0x12   : > { %v599_v20 = vmul.f32 %v2362_v5, %v234_v10  ;;  %v840_v21 = vmul.f32 %v2364_v6, %v2384_v14  ;;  %v905_v22 = vmul.f32 %v2366_v7, %v2384_v14  ;;  %v906_v23 = vmul.f32 %v2366_v7, %v2387_v15  ;;  %v235_v37 = vld [vmem:[%s2371_s25 + $0x10] sm:$0x3]  ;;  %v2428_v54 = vld [vmem:[%s2371_s25 + $0x28] sm:$0x3]  ;;  %v2440_v1 = vld [vmem:[%s2371_s25 + $0x40] sm:$0x3] }
  0x13   : > { %v453_v24 = vrot.slane %v356_v17, 1  ;;  %v454_v25 = vrot.slane %v357_v18, 1  ;;  %v695_v26 = vrot.slane %v598_v19, 2  ;;  %v1146_v27 = vmul.f32 %v2373_v8, %v2384_v14 }
  0x14   : > { %v696_v29 = vrot.slane %v599_v20, 2  ;;  %v1001_v30 = vrot.slane %v905_v22, 1  ;;  %v1002_v31 = vrot.slane %v906_v23, 1  ;;  %v1147_v32 = vmul.f32 %v2373_v8, %v2387_v15 }
  0x15   : > { %v455_v33 = vsel %vm452_vm0, %v453_v24, %v454_v25  ;;  %v1242_v34 = vrot.slane %v1146_v27, 2  ;;  %v1387_v35 = vmul.f32 %v2377_v11, %v2403_v28  ;;  %v1452_v36 = vmul.f32 %v2379_v12, %v2403_v28 }
  0x16   : > { %v565_v39 = vadd.f32 %v455_v33, %v291_v16  ;;  %v697_v40 = vsel %vm694_vm1, %v695_v26, %v696_v29  ;;  %v1003_v41 = vsel %vm452_vm0, %v1001_v30, %v1002_v31  ;;  %v1243_v42 = vrot.slane %v1147_v32, 2 }
  0x17   : > { %v1453_v43 = vmul.f32 %v2379_v12, %v2414_v38  ;;  %v1548_v44 = vrot.slane %v1452_v36, 1  ;;  %v1693_v45 = vmul.f32 %v2381_v13, %v2403_v28  ;;  %v1694_v46 = vmul.f32 %v2381_v13, %v2414_v38 }
  0x18   : > { %v807_v47 = vadd.f32 %v697_v40, %v565_v39  ;;  %v1244_v48 = vsel %vm694_vm1, %v1242_v34, %v1243_v42  ;;  %v292_v49 = vmul.f32 %v2358_v3, %v234_v10  ;;  %v358_v50 = vmul.f32 %v2360_v4, %v235_v37 }
  0x19   : > { %v1549_v51 = vrot.slane %v1453_v43, 1  ;;  %v1789_v52 = vrot.slane %v1693_v45, 2  ;;  %v1790_v53 = vrot.slane %v1694_v46, 2  ;;  %v600_v55 = vmul.f32 %v2362_v5, %v235_v37 }
  0x1a   : > { %v872_v56 = vadd.f32 %v840_v21, %v807_v47  ;;  %v456_v57 = vrot.slane %v358_v50, 1  ;;  %v841_v58 = vmul.f32 %v2364_v6, %v2387_v15  ;;  %v907_v59 = vmul.f32 %v2366_v7, %v2428_v54 }
  0x1b   : > { %v1550_v60 = vsel %vm452_vm0, %v1548_v44, %v1549_v51  ;;  %v1791_v61 = vsel %vm694_vm1, %v1789_v52, %v1790_v53  ;;  %v698_v62 = vrot.slane %v600_v55, 2  ;;  %v1148_v63 = vmul.f32 %v2373_v8, %v2428_v54  ;;  %v2488_v55 = vld [vmem:[%s2371_s25 + $0x48] sm:$0xff] }
  0x1c   : > { %v1113_v0 = vadd.f32 %v1003_v41, %v872_v56  ;;  %v457_v2 = vsel %vm452_vm0, %v454_v25, %v456_v57  ;;  %v1004_v9 = vrot.slane %v907_v59, 1  ;;  %v1388_v10 = vmul.f32 %v2377_v11, %v2414_v38 }
  0x1d   : > { %v566_v16 = vadd.f32 %v457_v2, %v292_v49  ;;  %v699_v17 = vsel %vm694_vm1, %v696_v29, %v698_v62  ;;  %v1245_v18 = vrot.slane %v1148_v63, 2  ;;  %v1454_v19 = vmul.f32 %v2379_v12, %v2440_v1  ;;  %v2501_v2 = vld [vmem:[%s2371_s25 + $0x50] sm:$0xff] }
  0x1e   : > { %v1354_v20 = vadd.f32 %v1244_v48, %v1113_v0  ;;  %v1005_v21 = vsel %vm452_vm0, %v1002_v31, %v1004_v9  ;;  %v1695_v22 = vmul.f32 %v2381_v13, %v2440_v1  ;;  %v293_v23 = vmul.f32 %v2358_v3, %v2384_v14 }
  0x1f   : > { %v808_v24 = vadd.f32 %v699_v17, %v566_v16  ;;  %v1246_v25 = vsel %vm694_vm1, %v1243_v42, %v1245_v18  ;;  %v1551_v26 = vrot.slane %v1454_v19, 1  ;;  %v359_v27 = vmul.f32 %v2360_v4, %v2384_v14 }
  0x20   : > { %v1419_v29 = vadd.f32 %v1387_v35, %v1354_v20  ;;  %v1792_v30 = vrot.slane %v1695_v22, 2  ;;  %v2458_v31 = vmul.f32 %v2360_v4, %v2387_v15  ;;  %v601_v32 = vmul.f32 %v2362_v5, %v2384_v14  ;;  %v2470_v35 = vld [vmem:[%s3721_s2] ss:$0 sm:$0xff] }
  0x21   : > { %v873_v33 = vadd.f32 %v841_v58, %v808_v24  ;;  %v1552_v34 = vsel %vm452_vm0, %v1549_v51, %v1551_v26  ;;  %v458_v36 = vrot.slane %v359_v27, 1  ;;  %v2465_v37 = vmul.f32 %v2362_v5, %v2387_v15 }
  0x22   : > { %v1660_v39 = vadd.f32 %v1550_v60, %v1419_v29  ;;  %v1793_v40 = vsel %vm694_vm1, %v1790_v53, %v1792_v30  ;;  %v459_v41 = vrot.slane %v2458_v31, 1  ;;  %v700_v14 = vrot.slane %v601_v32, 2 }
  0x23   : > { %v1114_v42 = vadd.f32 %v1005_v21, %v873_v33  ;;  %v701_v43 = vrot.slane %v2465_v37, 2  ;;  %v842_v44 = vmul.f32 %v2364_v6, %v2403_v28  ;;  %v908_v45 = vmul.f32 %v2366_v7, %v2403_v28 }
  0x24   : > { %v1901_v46 = vadd.f32 %v1791_v61, %v1660_v39  ;;  %v460_v47 = vsel %vm452_vm0, %v458_v36, %v459_v41  ;;  %v909_v48 = vmul.f32 %v2366_v7, %v2414_v38  ;;  %v1149_v49 = vmul.f32 %v2373_v8, %v2403_v28 }
  0x25   : > { %v1355_v50 = vadd.f32 %v1246_v25, %v1114_v42  ;;  %v567_v51 = vadd.f32 %v460_v47, %v293_v23  ;;  %v702_v52 = vsel %vm694_vm1, %v700_v14, %v701_v43  ;;  %v1006_v53 = vrot.slane %v908_v45, 1 }
  0x26   : > { %vm1937_vm3 = vcmp.ge.f32.partialorder %v1901_v46, %v2470_v35  ;;  %v1007_v56 = vrot.slane %v909_v48, 1  ;;  %v1150_v57 = vmul.f32 %v2373_v8, %v2414_v38  ;;  %v1247_v58 = vrot.slane %v1149_v49, 2 }
  0x27   : > { %v2307_v59 = vmov 0.0   ;;  %v1420_v61 = vadd.f32 %v1388_v10, %v1355_v50  ;;  %v809_v62 = vadd.f32 %v702_v52, %v567_v51  ;;  %v1389_v63 = vmul.f32 %v2377_v11, %v2488_v55 }
  0x28   : > { %v2219_v60 = vsel %vm1937_vm3, 1.0, %v2307_v59  ;;  %v1008_v9 = vsel %vm452_vm0, %v1006_v53, %v1007_v56  ;;  %v1248_v16 = vrot.slane %v1150_v57, 2  ;;  %v1455_v17 = vmul.f32 %v2379_v12, %v2488_v55 }
  0x29   : > { %v2033_v0 = vpack.c.bf16 %v2219_v60, %v2219_v60  ;;  %v1661_v18 = vadd.f32 %v1552_v34, %v1420_v61  ;;  %v874_v19 = vadd.f32 %v842_v44, %v809_v62  ;;  %v1456_v20 = vmul.f32 %v2379_v12, %v2501_v2  ;;  %v2530_v44 = vld [vmem:[%s2371_s25 + $0x58] sm:$0x3] }
  0x2a   : > { %v1696_v10 = vmul.f32 %v2381_v13, %v2488_v55  ;;  %v1249_v21 = vsel %vm694_vm1, %v1247_v58, %v1248_v16  ;;  %v1553_v22 = vrot.slane %v1455_v17, 1  ;;  %v1697_v23 = vmul.f32 %v2381_v13, %v2501_v2 }
  0x2b   : > { %2066 = vst.msk [vmem:[%s2495_s4] sm:$0xf] %vm2065_vm2, %v2033_v0  ;;  %v294_v24 = vmul.f32 %v2358_v3, %v2387_v15  ;;  %v1902_v25 = vadd.f32 %v1793_v40, %v1661_v18  ;;  %v1115_v26 = vadd.f32 %v1008_v9, %v874_v19  ;;  %v1554_v27 = vrot.slane %v1456_v20, 1 }
  0x2c   : > { %v1794_v29 = vrot.slane %v1696_v10, 2  ;;  %v1795_v30 = vrot.slane %v1697_v23, 2  ;;  %v361_v31 = vmul.f32 %v2360_v4, %v2428_v54  ;;  %v603_v32 = vmul.f32 %v2362_v5, %v2428_v54 }
  0x2d   : > { %v843_v33 = vmul.f32 %v2364_v6, %v2414_v38  ;;  %vm1938_vm4 = vcmp.ge.f32.partialorder %v1902_v25, %v2470_v35  ;;  %v1356_v34 = vadd.f32 %v1249_v21, %v1115_v26  ;;  %v1555_v15 = vsel %vm452_vm0, %v1553_v22, %v1554_v27 }
  0x2e   : > { %v910_v36 = vmul.f32 %v2366_v7, %v2440_v1  ;;  %v2220_v37 = vsel %vm1938_vm4, 1.0, %v2307_v59  ;;  %v1796_v39 = vsel %vm694_vm1, %v1794_v29, %v1795_v30  ;;  %v461_v40 = vrot.slane %v361_v31, 1 }
  0x2f   : > { %v703_v14 = vrot.slane %v603_v32, 2  ;;  %v2034_v42 = vpack.c.bf16 %v2220_v37, %v2220_v37  ;;  %v1421_v54 = vadd.f32 %v1389_v63, %v1356_v34  ;;  %v1151_v46 = vmul.f32 %v2373_v8, %v2440_v1  ;;  %v2583_v37 = vld [vmem:[%s2371_s25 + $0x68] sm:$0xff] }
  0x30   : > { %v1009_v45 = vrot.slane %v910_v36, 1  ;;  %v462_v47 = vsel %vm452_vm0, %v459_v41, %v461_v40  ;;  %v1390_v49 = vmul.f32 %v2377_v11, %v2501_v2  ;;  %v1457_v50 = vmul.f32 %v2379_v12, %v2530_v44 }
  0x31   : > { %v704_v48 = vsel %vm694_vm1, %v701_v43, %v703_v14  ;;  %2067 = vst.msk [vmem:[%s2495_s4 + $0x4] sm:$0xf] %vm2065_vm2, %v2034_v42  ;;  %v1662_v51 = vadd.f32 %v1555_v15, %v1421_v54  ;;  %v568_v52 = vadd.f32 %v462_v47, %v294_v24  ;;  %v1250_v57 = vrot.slane %v1151_v46, 2 }
  0x32   : > { %v1010_v53 = vsel %vm452_vm0, %v1007_v56, %v1009_v45  ;;  %v1556_v58 = vrot.slane %v1457_v50, 1  ;;  %v1698_v60 = vmul.f32 %v2381_v13, %v2530_v44  ;;  %v295_v41 = vmul.f32 %v2358_v3, %v2403_v28 }
  0x33   : > { %v362_v43 = vmul.f32 %v2360_v4, %v2403_v28  ;;  %v1903_v61 = vadd.f32 %v1796_v39, %v1662_v51  ;;  %v810_v62 = vadd.f32 %v704_v48, %v568_v52  ;;  %v1251_v63 = vsel %vm694_vm1, %v1248_v16, %v1250_v57 }
  0x34   : > { %v2552_v0 = vmul.f32 %v2360_v4, %v2414_v38  ;;  %v1557_v56 = vsel %vm452_vm0, %v1554_v27, %v1556_v58  ;;  %v1797_v9 = vrot.slane %v1698_v60, 2  ;;  %v604_v18 = vmul.f32 %v2362_v5, %v2403_v28  ;;  %v2567_v27 = vld [vmem:[%s2371_s25 + $0x60] sm:$0xff] }
  0x35   : > { %v463_v17 = vrot.slane %v362_v43, 1  ;;  %vm1939_vm5 = vcmp.ge.f32.partialorder %v1903_v61, %v2470_v35  ;;  %v875_v19 = vadd.f32 %v843_v33, %v810_v62  ;;  %v605_v16 = vmul.f32 %v2362_v5, %v2414_v38 }
  0x36   : > { %v464_v20 = vrot.slane %v2552_v0, 1  ;;  %v2221_v10 = vsel %vm1939_vm5, 1.0, %v2307_v59  ;;  %v1798_v21 = vsel %vm694_vm1, %v1795_v30, %v1797_v9  ;;  %v705_v22 = vrot.slane %v604_v18, 2 }
  0x37   : > { %v844_v23 = vmul.f32 %v2364_v6, %v2488_v55  ;;  %v2035_v24 = vpack.c.bf16 %v2221_v10, %v2221_v10  ;;  %v1116_v28 = vadd.f32 %v1010_v53, %v875_v19  ;;  %v706_v26 = vrot.slane %v605_v16, 2 }
  0x38   : > { %v465_v25 = vsel %vm452_vm0, %v463_v17, %v464_v20  ;;  %v911_v31 = vmul.f32 %v2366_v7, %v2488_v55  ;;  %v912_v32 = vmul.f32 %v2366_v7, %v2501_v2  ;;  %v1152_v30 = vmul.f32 %v2373_v8, %v2488_v55 }
  0x39   : > { %v569_v29 = vadd.f32 %v465_v25, %v295_v41  ;;  %2068 = vst.msk [vmem:[%s2495_s4 + $0x8] sm:$0xf] %vm2065_vm2, %v2035_v24  ;;  %v1357_v33 = vadd.f32 %v1251_v63, %v1116_v28  ;;  %v707_v34 = vsel %vm694_vm1, %v705_v22, %v706_v26  ;;  %v1153_v15 = vmul.f32 %v2373_v8, %v2501_v2  ;;  %v2614_v28 = vld [vmem:[%s2371_s25 + $0x70] sm:$0x3] }
  0x3a   : > { %v1391_v36 = vmul.f32 %v2377_v11, %v2567_v27  ;;  %v1011_v40 = vrot.slane %v911_v31, 1  ;;  %v1012_v14 = vrot.slane %v912_v32, 1  ;;  %v1252_v42 = vrot.slane %v1152_v30, 2 }
  0x3b   : > { %v811_v39 = vadd.f32 %v707_v34, %v569_v29  ;;  %v1422_v54 = vadd.f32 %v1390_v49, %v1357_v33  ;;  %v1253_v45 = vrot.slane %v1153_v15, 2  ;;  %v1458_v46 = vmul.f32 %v2379_v12, %v2567_v27 }
  0x3c   : > { %v1459_v47 = vmul.f32 %v2379_v12, %v2583_v37  ;;  %v1013_v50 = vsel %vm452_vm0, %v1011_v40, %v1012_v14  ;;  %v1699_v51 = vmul.f32 %v2381_v13, %v2567_v27  ;;  %v1700_v52 = vmul.f32 %v2381_v13, %v2583_v37 }
  0x3d   : > { %v876_v48 = vadd.f32 %v844_v23, %v811_v39  ;;  %v1663_v53 = vadd.f32 %v1557_v56, %v1422_v54  ;;  %v1254_v57 = vsel %vm694_vm1, %v1252_v42, %v1253_v45  ;;  %v1558_v49 = vrot.slane %v1458_v46, 1 }
  0x3e   : > { %v1559_v58 = vrot.slane %v1459_v47, 1  ;;  %v1799_v41 = vrot.slane %v1699_v51, 2  ;;  %v1800_v43 = vrot.slane %v1700_v52, 2  ;;  %v296_v61 = vmul.f32 %v2358_v3, %v2414_v38 }
  0x3f   : > { %v1117_v60 = vadd.f32 %v1013_v50, %v876_v48  ;;  %v1904_v62 = vadd.f32 %v1798_v21, %v1663_v53  ;;  %v364_v0 = vmul.f32 %v2360_v4, %v2440_v1  ;;  %v606_v56 = vmul.f32 %v2362_v5, %v2440_v1 }
  0x40   : > { %v1560_v63 = vsel %vm452_vm0, %v1558_v49, %v1559_v58  ;;  %v1801_v17 = vsel %vm694_vm1, %v1799_v41, %v1800_v43  ;;  %v845_v18 = vmul.f32 %v2364_v6, %v2501_v2  ;;  %v913_v19 = vmul.f32 %v2366_v7, %v2530_v44 }
  0x41   : > { %v1358_v9 = vadd.f32 %v1254_v57, %v1117_v60  ;;  %vm1940_vm6 = vcmp.ge.f32.partialorder %v1904_v62, %v2470_v35  ;;  %v466_v38 = vrot.slane %v364_v0, 1  ;;  %v708_v16 = vrot.slane %v606_v56, 2  ;;  %v2650_v62 = vld [vmem:[%s2371_s25 + $0x78] sm:$0xff] }
  0x42   : > { %v1154_v10 = vmul.f32 %v2373_v8, %v2530_v44  ;;  %v2222_v21 = vsel %vm1940_vm6, 1.0, %v2307_v59  ;;  %v1014_v22 = vrot.slane %v913_v19, 1  ;;  %v1392_v23 = vmul.f32 %v2377_v11, %v2583_v37  ;;  %v2666_v19 = vld [vmem:[%s2371_s25 + $0x80] sm:$0xff] }
  0x43   : > { %v1423_v1 = vadd.f32 %v1391_v36, %v1358_v9  ;;  %v2036_v24 = vpack.c.bf16 %v2222_v21, %v2222_v21  ;;  %v467_v25 = vsel %vm452_vm0, %v464_v20, %v466_v38  ;;  %v709_v29 = vsel %vm694_vm1, %v706_v26, %v708_v16 }
  0x44   : > { %v1255_v31 = vrot.slane %v1154_v10, 2  ;;  %v570_v30 = vadd.f32 %v467_v25, %v296_v61  ;;  %v1015_v33 = vsel %vm452_vm0, %v1012_v14, %v1014_v22  ;;  %v1460_v34 = vmul.f32 %v2379_v12, %v2614_v28 }
  0x45   : > { %v1664_v32 = vadd.f32 %v1560_v63, %v1423_v1  ;;  %2069 = vst.msk [vmem:[%s2495_s4 + $0xc] sm:$0xf] %vm2065_vm2, %v2036_v24  ;;  %v1701_v36 = vmul.f32 %v2381_v13, %v2614_v28  ;;  %v297_v20 = vmul.f32 %v2358_v3, %v2488_v55  ;;  %v365_v26 = vmul.f32 %v2360_v4, %v2488_v55 }
  0x46   : > { %v1256_v15 = vsel %vm694_vm1, %v1253_v45, %v1255_v31  ;;  %v812_v40 = vadd.f32 %v709_v29, %v570_v30  ;;  %v1561_v42 = vrot.slane %v1460_v34, 1  ;;  %v2632_v14 = vmul.f32 %v2360_v4, %v2501_v2 }
  0x47   : > { %v1905_v39 = vadd.f32 %v1801_v17, %v1664_v32  ;;  %v1802_v54 = vrot.slane %v1701_v36, 2  ;;  %v468_v46 = vrot.slane %v365_v26, 1  ;;  %v607_v45 = vmul.f32 %v2362_v5, %v2488_v55 }
  0x48   : > { %v2638_v47 = vmul.f32 %v2362_v5, %v2501_v2  ;;  %v877_v48 = vadd.f32 %v845_v18, %v812_v40  ;;  %v1562_v50 = vsel %vm452_vm0, %v1559_v58, %v1561_v42  ;;  %v469_v51 = vrot.slane %v2632_v14, 1 }
  0x49   : > { %vm1941_vm7 = vcmp.ge.f32.partialorder %v1905_v39, %v2470_v35  ;;  %v1803_v53 = vsel %vm694_vm1, %v1800_v43, %v1802_v54  ;;  %v710_v57 = vrot.slane %v607_v45, 2  ;;  %v846_v61 = vmul.f32 %v2364_v6, %v2567_v27 }
  0x4a   : > { %v2223_v52 = vsel %vm1941_vm7, 1.0, %v2307_v59  ;;  %v711_v55 = vrot.slane %v2638_v47, 2  ;;  %v1118_v60 = vadd.f32 %v1015_v33, %v877_v48  ;;  %v470_v41 = vsel %vm452_vm0, %v468_v46, %v469_v51 }
  0x4b   : > { %v2037_v49 = vpack.c.bf16 %v2223_v52, %v2223_v52  ;;  %v571_v58 = vadd.f32 %v470_v41, %v297_v20  ;;  %v914_v0 = vmul.f32 %v2366_v7, %v2567_v27  ;;  %v915_v43 = vmul.f32 %v2366_v7, %v2583_v37  ;;  %v2696_v41 = vld [vmem:[%s2371_s25 + $0x88] sm:$0x3] }
  0x4c   : > { %v712_v63 = vsel %vm694_vm1, %v710_v57, %v711_v55  ;;  %v1359_v56 = vadd.f32 %v1256_v15, %v1118_v60  ;;  %v1155_v9 = vmul.f32 %v2373_v8, %v2567_v27  ;;  %v1156_v17 = vmul.f32 %v2373_v8, %v2583_v37 }
  0x4d   : > { %2070 = vst.msk [vmem:[%s2495_s4 + $0x10] sm:$0xf] %vm2065_vm2, %v2037_v49  ;;  %v1393_v18 = vmul.f32 %v2377_v11, %v2650_v62  ;;  %v813_v38 = vadd.f32 %v712_v63, %v571_v58  ;;  %v1016_v16 = vrot.slane %v914_v0, 1  ;;  %v1017_v10 = vrot.slane %v915_v43, 1 }
  0x4e   : > { %v1461_v21 = vmul.f32 %v2379_v12, %v2650_v62  ;;  %v1424_v1 = vadd.f32 %v1392_v23, %v1359_v56  ;;  %v1257_v22 = vrot.slane %v1155_v9, 2  ;;  %v1258_v24 = vrot.slane %v1156_v17, 2 }
  0x4f   : > { %v1462_v25 = vmul.f32 %v2379_v12, %v2666_v19  ;;  %v878_v29 = vadd.f32 %v846_v61, %v813_v38  ;;  %v1018_v31 = vsel %vm452_vm0, %v1016_v16, %v1017_v10  ;;  %v1702_v30 = vmul.f32 %v2381_v13, %v2650_v62 }
  0x50   : > { %v1563_v32 = vrot.slane %v1461_v21, 1  ;;  %v1665_v33 = vadd.f32 %v1562_v50, %v1424_v1  ;;  %v1259_v34 = vsel %vm694_vm1, %v1257_v22, %v1258_v24  ;;  %v1703_v36 = vmul.f32 %v2381_v13, %v2666_v19 }
  0x51   : > { %v1564_v15 = vrot.slane %v1462_v25, 1  ;;  %v1119_v23 = vadd.f32 %v1018_v31, %v878_v29  ;;  %v1804_v20 = vrot.slane %v1702_v30, 2  ;;  %v298_v26 = vmul.f32 %v2358_v3, %v2501_v2 }
  0x52   : > { %v367_v39 = vmul.f32 %v2360_v4, %v2530_v44  ;;  %v1906_v40 = vadd.f32 %v1803_v53, %v1665_v33  ;;  %v1805_v14 = vrot.slane %v1703_v36, 2  ;;  %v609_v54 = vmul.f32 %v2362_v5, %v2530_v44 }
  0x53   : > { %v1565_v42 = vsel %vm452_vm0, %v1563_v32, %v1564_v15  ;;  %v1360_v46 = vadd.f32 %v1259_v34, %v1119_v23  ;;  %v847_v47 = vmul.f32 %v2364_v6, %v2583_v37  ;;  %v916_v48 = vmul.f32 %v2366_v7, %v2614_v28 }
  0x54   : > { %v471_v45 = vrot.slane %v367_v39, 1  ;;  %vm1942_vm8 = vcmp.ge.f32.partialorder %v1906_v40, %v2470_v35  ;;  %v1806_v2 = vsel %vm694_vm1, %v1804_v20, %v1805_v14  ;;  %v713_v50 = vrot.slane %v609_v54, 2  ;;  %v2733_v39 = vld [vmem:[%s2371_s25 + $0x90] sm:$0xff] }
  0x55   : > { %v1157_v52 = vmul.f32 %v2373_v8, %v2614_v28  ;;  %v2224_v53 = vsel %vm1942_vm8, 1.0, %v2307_v59  ;;  %v1425_v44 = vadd.f32 %v1393_v18, %v1360_v46  ;;  %v1019_v49 = vrot.slane %v916_v48, 1 }
  0x56   : > { %v472_v57 = vsel %vm452_vm0, %v469_v51, %v471_v45  ;;  %v2038_v60 = vpack.c.bf16 %v2224_v53, %v2224_v53  ;;  %v714_v58 = vsel %vm694_vm1, %v711_v55, %v713_v50  ;;  %v1394_v56 = vmul.f32 %v2377_v11, %v2666_v19 }
  0x57   : > { %v572_v61 = vadd.f32 %v472_v57, %v298_v26  ;;  %v1260_v63 = vrot.slane %v1157_v52, 2  ;;  %v1666_v0 = vadd.f32 %v1565_v42, %v1425_v44  ;;  %v1020_v43 = vsel %vm452_vm0, %v1017_v10, %v1019_v49 }
  0x58   : > { %v1463_v9 = vmul.f32 %v2379_v12, %v2696_v41  ;;  %2071 = vst.msk [vmem:[%s2495_s4 + $0x14] sm:$0xf] %vm2065_vm2, %v2038_v60  ;;  %v1704_v18 = vmul.f32 %v2381_v13, %v2696_v41  ;;  %v299_v55 = vmul.f32 %v2358_v3, %v2567_v27  ;;  %v368_v10 = vmul.f32 %v2360_v4, %v2567_v27 }
  0x59   : > { %v814_v51 = vadd.f32 %v714_v58, %v572_v61  ;;  %v1261_v17 = vsel %vm694_vm1, %v1258_v24, %v1260_v63  ;;  %v1907_v38 = vadd.f32 %v1806_v2, %v1666_v0  ;;  %v2715_v21 = vmul.f32 %v2360_v4, %v2583_v37  ;;  %v2749_v2 = vld [vmem:[%s2371_s25 + $0x98] sm:$0xff] }
  0x5a   : > { %v1566_v16 = vrot.slane %v1463_v9, 1  ;;  %v1807_v22 = vrot.slane %v1704_v18, 2  ;;  %v610_v24 = vmul.f32 %v2362_v5, %v2567_v27  ;;  %v2721_v25 = vmul.f32 %v2362_v5, %v2583_v37 }
  0x5b   : > { %v879_v1 = vadd.f32 %v847_v47, %v814_v51  ;;  %vm1943_vm9 = vcmp.ge.f32.partialorder %v1907_v38, %v2470_v35  ;;  %v473_v31 = vrot.slane %v368_v10, 1  ;;  %v474_v32 = vrot.slane %v2715_v21, 1 }
  0x5c   : > { %v1567_v29 = vsel %vm452_vm0, %v1564_v15, %v1566_v16  ;;  %v2225_v30 = vsel %vm1943_vm9, 1.0, %v2307_v59  ;;  %v1808_v34 = vsel %vm694_vm1, %v1805_v14, %v1807_v22  ;;  %v715_v36 = vrot.slane %v610_v24, 2 }
  0x5d   : > { %v1120_v33 = vadd.f32 %v1020_v43, %v879_v1  ;;  %v2039_v27 = vpack.c.bf16 %v2225_v30, %v2225_v30  ;;  %v475_v23 = vsel %vm452_vm0, %v473_v31, %v474_v32  ;;  %v716_v20 = vrot.slane %v2721_v25, 2 }
  0x5e   : > { %v848_v26 = vmul.f32 %v2364_v6, %v2650_v62  ;;  %v573_v40 = vadd.f32 %v475_v23, %v299_v55  ;;  %v917_v42 = vmul.f32 %v2366_v7, %v2650_v62  ;;  %v918_v14 = vmul.f32 %v2366_v7, %v2666_v19 }
  0x5f   : > { %v1361_v15 = vadd.f32 %v1261_v17, %v1120_v33  ;;  %2072 = vst.msk [vmem:[%s2495_s4 + $0x18] sm:$0xf] %vm2065_vm2, %v2039_v27  ;;  %v717_v54 = vsel %vm694_vm1, %v715_v36, %v716_v20  ;;  %v1158_v46 = vmul.f32 %v2373_v8, %v2650_v62  ;;  %v1159_v45 = vmul.f32 %v2373_v8, %v2666_v19  ;;  %v2776_v36 = vld [vmem:[%s2371_s25 + $0xa0] sm:$0x3] }
  0x60   : > { %v1395_v47 = vmul.f32 %v2377_v11, %v2733_v39  ;;  %v815_v50 = vadd.f32 %v717_v54, %v573_v40  ;;  %v1021_v52 = vrot.slane %v917_v42, 1  ;;  %v1022_v53 = vrot.slane %v918_v14, 1 }
  0x61   : > { %v1426_v48 = vadd.f32 %v1394_v56, %v1361_v15  ;;  %v1262_v44 = vrot.slane %v1158_v46, 2  ;;  %v1263_v57 = vrot.slane %v1159_v45, 2  ;;  %v1464_v49 = vmul.f32 %v2379_v12, %v2733_v39 }
  0x62   : > { %v1465_v60 = vmul.f32 %v2379_v12, %v2749_v2  ;;  %v880_v58 = vadd.f32 %v848_v26, %v815_v50  ;;  %v1023_v63 = vsel %vm452_vm0, %v1021_v52, %v1022_v53  ;;  %v1705_v0 = vmul.f32 %v2381_v13, %v2733_v39 }
  0x63   : > { %v1667_v61 = vadd.f32 %v1567_v29, %v1426_v48  ;;  %v1264_v43 = vsel %vm694_vm1, %v1262_v44, %v1263_v57  ;;  %v1568_v56 = vrot.slane %v1464_v49, 1  ;;  %v1706_v51 = vmul.f32 %v2381_v13, %v2749_v2 }
  0x64   : > { %v1569_v9 = vrot.slane %v1465_v60, 1  ;;  %v1121_v18 = vadd.f32 %v1023_v63, %v880_v58  ;;  %v1809_v55 = vrot.slane %v1705_v0, 2  ;;  %v300_v38 = vmul.f32 %v2358_v3, %v2583_v37 }
  0x65   : > { %v1908_v17 = vadd.f32 %v1808_v34, %v1667_v61  ;;  %v1810_v10 = vrot.slane %v1706_v51, 2  ;;  %v370_v21 = vmul.f32 %v2360_v4, %v2614_v28  ;;  %v612_v1 = vmul.f32 %v2362_v5, %v2614_v28 }
  0x66   : > { %v1570_v16 = vsel %vm452_vm0, %v1568_v56, %v1569_v9  ;;  %v1362_v22 = vadd.f32 %v1264_v43, %v1121_v18  ;;  %v849_v24 = vmul.f32 %v2364_v6, %v2666_v19  ;;  %v919_v25 = vmul.f32 %v2366_v7, %v2696_v41 }
  0x67   : > { %vm1944_vm10 = vcmp.ge.f32.partialorder %v1908_v17, %v2470_v35  ;;  %v1811_v29 = vsel %vm694_vm1, %v1809_v55, %v1810_v10  ;;  %v476_v31 = vrot.slane %v370_v21, 1  ;;  %v718_v30 = vrot.slane %v612_v1, 2  ;;  %v2813_v55 = vld [vmem:[%s2371_s25 + $0xa8] sm:$0xff] }
  0x68   : > { %v2226_v37 = vsel %vm1944_vm10, 1.0, %v2307_v59  ;;  %v1427_v34 = vadd.f32 %v1395_v47, %v1362_v22  ;;  %v1024_v28 = vrot.slane %v919_v25, 1  ;;  %v1160_v27 = vmul.f32 %v2373_v8, %v2696_v41 }
  0x69   : > { %v2040_v33 = vpack.c.bf16 %v2226_v37, %v2226_v37  ;;  %v477_v23 = vsel %vm452_vm0, %v474_v32, %v476_v31  ;;  %v719_v26 = vsel %vm694_vm1, %v716_v20, %v718_v30  ;;  %v1396_v15 = vmul.f32 %v2377_v11, %v2749_v2  ;;  %v2829_v37 = vld [vmem:[%s2371_s25 + $0xb0] sm:$0xff] }
  0x6a   : > { %v1466_v40 = vmul.f32 %v2379_v12, %v2776_v36  ;;  %v1668_v42 = vadd.f32 %v1570_v16, %v1427_v34  ;;  %v574_v14 = vadd.f32 %v477_v23, %v300_v38  ;;  %v1025_v54 = vsel %vm452_vm0, %v1022_v53, %v1024_v28 }
  0x6b   : > { %2073 = vst.msk [vmem:[%s2495_s4 + $0x1c] sm:$0xf] %vm2065_vm2, %v2040_v33  ;;  %v1265_v46 = vrot.slane %v1160_v27, 2  ;;  %v1707_v47 = vmul.f32 %v2381_v13, %v2776_v36  ;;  %v301_v32 = vmul.f32 %v2358_v3, %v2650_v62  ;;  %v371_v20 = vmul.f32 %v2360_v4, %v2650_v62 }
  0x6c   : > { %v1571_v45 = vrot.slane %v1466_v40, 1  ;;  %v1909_v48 = vadd.f32 %v1811_v29, %v1668_v42  ;;  %v816_v50 = vadd.f32 %v719_v26, %v574_v14  ;;  %v2798_v44 = vmul.f32 %v2360_v4, %v2666_v19 }
  0x6d   : > { %v1266_v52 = vsel %vm694_vm1, %v1263_v57, %v1265_v46  ;;  %v1812_v49 = vrot.slane %v1707_v47, 2  ;;  %v478_v60 = vrot.slane %v371_v20, 1  ;;  %v613_v61 = vmul.f32 %v2362_v5, %v2650_v62 }
  0x6e   : > { %v1572_v53 = vsel %vm452_vm0, %v1569_v9, %v1571_v45  ;;  %vm1945_vm11 = vcmp.ge.f32.partialorder %v1909_v48, %v2470_v35  ;;  %v881_v58 = vadd.f32 %v849_v24, %v816_v50  ;;  %v479_v63 = vrot.slane %v2798_v44, 1 }
  0x6f   : > { %v614_v57 = vmul.f32 %v2362_v5, %v2666_v19  ;;  %v2227_v0 = vsel %vm1945_vm11, 1.0, %v2307_v59  ;;  %v1813_v43 = vsel %vm694_vm1, %v1810_v10, %v1812_v49  ;;  %v720_v56 = vrot.slane %v613_v61, 2 }
  0x70   : > { %v850_v9 = vmul.f32 %v2364_v6, %v2733_v39  ;;  %v2041_v51 = vpack.c.bf16 %v2227_v0, %v2227_v0  ;;  %v1122_v62 = vadd.f32 %v1025_v54, %v881_v58  ;;  %v480_v17 = vsel %vm452_vm0, %v478_v60, %v479_v63 }
  0x71   : > { %v721_v18 = vrot.slane %v614_v57, 2  ;;  %v575_v38 = vadd.f32 %v480_v17, %v301_v32  ;;  %v920_v16 = vmul.f32 %v2366_v7, %v2733_v39  ;;  %v921_v21 = vmul.f32 %v2366_v7, %v2749_v2 }
  0x72   : > { %v1161_v10 = vmul.f32 %v2373_v8, %v2733_v39  ;;  %2074 = vst.msk [vmem:[%s2495_s4 + $0x20] sm:$0xf] %vm2065_vm2, %v2041_v51  ;;  %v1363_v1 = vadd.f32 %v1266_v52, %v1122_v62  ;;  %v1162_v24 = vmul.f32 %v2373_v8, %v2749_v2  ;;  %v1397_v25 = vmul.f32 %v2377_v11, %v2813_v55  ;;  %v2860_v62 = vld [vmem:[%s2371_s25 + $0xb8] sm:$0x3] }
  0x73   : > { %v722_v22 = vsel %vm694_vm1, %v720_v56, %v721_v18  ;;  %v1026_v31 = vrot.slane %v920_v16, 1  ;;  %v1027_v30 = vrot.slane %v921_v21, 1  ;;  %v1467_v27 = vmul.f32 %v2379_v12, %v2813_v55 }
  0x74   : > { %v817_v29 = vadd.f32 %v722_v22, %v575_v38  ;;  %v1267_v33 = vrot.slane %v1161_v10, 2  ;;  %v1428_v34 = vadd.f32 %v1396_v15, %v1363_v1  ;;  %v1268_v28 = vrot.slane %v1162_v24, 2 }
  0x75   : > { %v1468_v23 = vmul.f32 %v2379_v12, %v2829_v37  ;;  %v1028_v40 = vsel %vm452_vm0, %v1026_v31, %v1027_v30  ;;  %v1708_v42 = vmul.f32 %v2381_v13, %v2813_v55  ;;  %v1709_v14 = vmul.f32 %v2381_v13, %v2829_v37 }
  0x76   : > { %v882_v26 = vadd.f32 %v850_v9, %v817_v29  ;;  %v1669_v54 = vadd.f32 %v1572_v53, %v1428_v34  ;;  %v1269_v46 = vsel %vm694_vm1, %v1267_v33, %v1268_v28  ;;  %v1573_v15 = vrot.slane %v1467_v27, 1 }
  0x77   : > { %v1574_v45 = vrot.slane %v1468_v23, 1  ;;  %v1814_v32 = vrot.slane %v1708_v42, 2  ;;  %v1815_v20 = vrot.slane %v1709_v14, 2  ;;  %v302_v48 = vmul.f32 %v2358_v3, %v2666_v19 }
  0x78   : > { %v1123_v47 = vadd.f32 %v1028_v40, %v882_v26  ;;  %v1910_v50 = vadd.f32 %v1813_v43, %v1669_v54  ;;  %v373_v44 = vmul.f32 %v2360_v4, %v2696_v41  ;;  %v615_v53 = vmul.f32 %v2362_v5, %v2696_v41 }
  0x79   : > { %v1575_v52 = vsel %vm452_vm0, %v1573_v15, %v1574_v45  ;;  %v1816_v60 = vsel %vm694_vm1, %v1814_v32, %v1815_v20  ;;  %v851_v61 = vmul.f32 %v2364_v6, %v2749_v2  ;;  %v922_v58 = vmul.f32 %v2366_v7, %v2776_v36 }
  0x7a   : > { %v1364_v49 = vadd.f32 %v1269_v46, %v1123_v47  ;;  %vm1946_vm12 = vcmp.ge.f32.partialorder %v1910_v50, %v2470_v35  ;;  %v481_v19 = vrot.slane %v373_v44, 1  ;;  %v723_v57 = vrot.slane %v615_v53, 2  ;;  %v2896_v50 = vld [vmem:[%s2371_s25 + $0xc0] sm:$0xff] }
  0x7b   : > { %v1163_v0 = vmul.f32 %v2373_v8, %v2776_v36  ;;  %v2228_v43 = vsel %vm1946_vm12, 1.0, %v2307_v59  ;;  %v1029_v56 = vrot.slane %v922_v58, 1  ;;  %v1398_v9 = vmul.f32 %v2377_v11, %v2829_v37  ;;  %v2912_v58 = vld [vmem:[%s2371_s25 + $0xc8] sm:$0xff] }
  0x7c   : > { %v1429_v41 = vadd.f32 %v1397_v25, %v1364_v49  ;;  %v2042_v51 = vpack.c.bf16 %v2228_v43, %v2228_v43  ;;  %v482_v17 = vsel %vm452_vm0, %v479_v63, %v481_v19  ;;  %v724_v38 = vsel %vm694_vm1, %v721_v18, %v723_v57 }
  0x7d   : > { %v1270_v16 = vrot.slane %v1163_v0, 2  ;;  %v576_v10 = vadd.f32 %v482_v17, %v302_v48  ;;  %v1030_v1 = vsel %vm452_vm0, %v1027_v30, %v1029_v56  ;;  %v1469_v22 = vmul.f32 %v2379_v12, %v2860_v62 }
  0x7e   : > { %v1670_v21 = vadd.f32 %v1575_v52, %v1429_v41  ;;  %2075 = vst.msk [vmem:[%s2495_s4 + $0x24] sm:$0xf] %vm2065_vm2, %v2042_v51  ;;  %v1710_v25 = vmul.f32 %v2381_v13, %v2860_v62  ;;  %v303_v63 = vmul.f32 %v2358_v3, %v2733_v39  ;;  %v374_v18 = vmul.f32 %v2360_v4, %v2733_v39 }
  0x7f   : > { %v1271_v24 = vsel %vm694_vm1, %v1268_v28, %v1270_v16  ;;  %v818_v31 = vadd.f32 %v724_v38, %v576_v10  ;;  %v1576_v33 = vrot.slane %v1469_v22, 1  ;;  %v2878_v30 = vmul.f32 %v2360_v4, %v2749_v2 }
  0x80   : > { %v1911_v29 = vadd.f32 %v1816_v60, %v1670_v21  ;;  %v1817_v34 = vrot.slane %v1710_v25, 2  ;;  %v483_v27 = vrot.slane %v374_v18, 1  ;;  %v616_v28 = vmul.f32 %v2362_v5, %v2733_v39 }
  0x81   : > { %v2884_v23 = vmul.f32 %v2362_v5, %v2749_v2  ;;  %v883_v26 = vadd.f32 %v851_v61, %v818_v31  ;;  %v1577_v40 = vsel %vm452_vm0, %v1574_v45, %v1576_v33  ;;  %v484_v42 = vrot.slane %v2878_v30, 1 }
  0x82   : > { %vm1947_vm13 = vcmp.ge.f32.partialorder %v1911_v29, %v2470_v35  ;;  %v1818_v54 = vsel %vm694_vm1, %v1815_v20, %v1817_v34  ;;  %v725_v46 = vrot.slane %v616_v28, 2  ;;  %v852_v48 = vmul.f32 %v2364_v6, %v2813_v55 }
  0x83   : > { %v2229_v14 = vsel %vm1947_vm13, 1.0, %v2307_v59  ;;  %v726_v39 = vrot.slane %v2884_v23, 2  ;;  %v1124_v47 = vadd.f32 %v1030_v1, %v883_v26  ;;  %v485_v32 = vsel %vm452_vm0, %v483_v27, %v484_v42 }
  0x84   : > { %v2043_v15 = vpack.c.bf16 %v2229_v14, %v2229_v14  ;;  %v577_v45 = vadd.f32 %v485_v32, %v303_v63  ;;  %v923_v44 = vmul.f32 %v2366_v7, %v2813_v55  ;;  %v924_v20 = vmul.f32 %v2366_v7, %v2829_v37  ;;  %v2942_v32 = vld [vmem:[%s2371_s25 + $0xd0] sm:$0x3] }
  0x85   : > { %v727_v52 = vsel %vm694_vm1, %v725_v46, %v726_v39  ;;  %v1365_v53 = vadd.f32 %v1271_v24, %v1124_v47  ;;  %v1164_v49 = vmul.f32 %v2373_v8, %v2813_v55  ;;  %v1165_v60 = vmul.f32 %v2373_v8, %v2829_v37 }
  0x86   : > { %2076 = vst.msk [vmem:[%s2495_s4 + $0x28] sm:$0xf] %vm2065_vm2, %v2043_v15  ;;  %v1399_v61 = vmul.f32 %v2377_v11, %v2896_v50  ;;  %v819_v19 = vadd.f32 %v727_v52, %v577_v45  ;;  %v1031_v57 = vrot.slane %v923_v44, 1  ;;  %v1032_v0 = vrot.slane %v924_v20, 1 }
  0x87   : > { %v1470_v43 = vmul.f32 %v2379_v12, %v2896_v50  ;;  %v1430_v41 = vadd.f32 %v1398_v9, %v1365_v53  ;;  %v1272_v56 = vrot.slane %v1164_v49, 2  ;;  %v1273_v51 = vrot.slane %v1165_v60, 2 }
  0x88   : > { %v1471_v17 = vmul.f32 %v2379_v12, %v2912_v58  ;;  %v884_v38 = vadd.f32 %v852_v48, %v819_v19  ;;  %v1033_v16 = vsel %vm452_vm0, %v1031_v57, %v1032_v0  ;;  %v1711_v10 = vmul.f32 %v2381_v13, %v2896_v50 }
  0x89   : > { %v1578_v21 = vrot.slane %v1470_v43, 1  ;;  %v1671_v1 = vadd.f32 %v1577_v40, %v1430_v41  ;;  %v1274_v22 = vsel %vm694_vm1, %v1272_v56, %v1273_v51  ;;  %v1712_v25 = vmul.f32 %v2381_v13, %v2912_v58 }
  0x8a   : > { %v1579_v24 = vrot.slane %v1471_v17, 1  ;;  %v1125_v9 = vadd.f32 %v1033_v16, %v884_v38  ;;  %v1819_v63 = vrot.slane %v1711_v10, 2  ;;  %v304_v18 = vmul.f32 %v2358_v3, %v2749_v2 }
  0x8b   : > { %v376_v29 = vmul.f32 %v2360_v4, %v2776_v36  ;;  %v1912_v31 = vadd.f32 %v1818_v54, %v1671_v1  ;;  %v1820_v30 = vrot.slane %v1712_v25, 2  ;;  %v618_v34 = vmul.f32 %v2362_v5, %v2776_v36 }
  0x8c   : > { %v1580_v33 = vsel %vm452_vm0, %v1578_v21, %v1579_v24  ;;  %v1366_v27 = vadd.f32 %v1274_v22, %v1125_v9  ;;  %v853_v23 = vmul.f32 %v2364_v6, %v2829_v37  ;;  %v925_v26 = vmul.f32 %v2366_v7, %v2860_v62 }
  0x8d   : > { %v486_v28 = vrot.slane %v376_v29, 1  ;;  %vm1948_vm14 = vcmp.ge.f32.partialorder %v1912_v31, %v2470_v35  ;;  %v1821_v2 = vsel %vm694_vm1, %v1819_v63, %v1820_v30  ;;  %v728_v40 = vrot.slane %v618_v34, 2 }
  0x8e   : > { %v1166_v14 = vmul.f32 %v2373_v8, %v2860_v62  ;;  %v2230_v54 = vsel %vm1948_vm14, 1.0, %v2307_v59  ;;  %v1431_v36 = vadd.f32 %v1399_v61, %v1366_v27  ;;  %v1034_v15 = vrot.slane %v925_v26, 1  ;;  %v2995_v26 = vld [vmem:[%s2371_s25 + $0xe0] sm:$0xff] }
  0x8f   : > { %v487_v46 = vsel %vm452_vm0, %v484_v42, %v486_v28  ;;  %v2044_v47 = vpack.c.bf16 %v2230_v54, %v2230_v54  ;;  %v729_v45 = vsel %vm694_vm1, %v726_v39, %v728_v40  ;;  %v1400_v53 = vmul.f32 %v2377_v11, %v2912_v58 }
  0x90   : > { %v578_v48 = vadd.f32 %v487_v46, %v304_v18  ;;  %v1275_v52 = vrot.slane %v1166_v14, 2  ;;  %v1672_v44 = vadd.f32 %v1580_v33, %v1431_v36  ;;  %v1035_v20 = vsel %vm452_vm0, %v1032_v0, %v1034_v15  ;;  %v2979_v18 = vld [vmem:[%s2371_s25 + $0xd8] sm:$0xff] }
  0x91   : > { %v1472_v49 = vmul.f32 %v2379_v12, %v2942_v32  ;;  %2077 = vst.msk [vmem:[%s2495_s4 + $0x2c] sm:$0xf] %vm2065_vm2, %v2044_v47  ;;  %v1713_v61 = vmul.f32 %v2381_v13, %v2942_v32  ;;  %v305_v39 = vmul.f32 %v2358_v3, %v2813_v55  ;;  %v377_v0 = vmul.f32 %v2360_v4, %v2813_v55 }
  0x92   : > { %v820_v42 = vadd.f32 %v729_v45, %v578_v48  ;;  %v1276_v60 = vsel %vm694_vm1, %v1273_v51, %v1275_v52  ;;  %v1913_v19 = vadd.f32 %v1821_v2, %v1672_v44  ;;  %v2961_v43 = vmul.f32 %v2360_v4, %v2829_v37 }
  0x93   : > { %v1581_v57 = vrot.slane %v1472_v49, 1  ;;  %v1822_v56 = vrot.slane %v1713_v61, 2  ;;  %v619_v51 = vmul.f32 %v2362_v5, %v2813_v55  ;;  %v2967_v17 = vmul.f32 %v2362_v5, %v2829_v37 }
  0x94   : > { %v885_v41 = vadd.f32 %v853_v23, %v820_v42  ;;  %vm1949_vm15 = vcmp.ge.f32.partialorder %v1913_v19, %v2470_v35  ;;  %v488_v16 = vrot.slane %v377_v0, 1  ;;  %v489_v21 = vrot.slane %v2961_v43, 1 }
  0x95   : > { %v1582_v38 = vsel %vm452_vm0, %v1579_v24, %v1581_v57  ;;  %v2231_v10 = vsel %vm1949_vm15, 1.0, %v2307_v59  ;;  %v1823_v22 = vsel %vm694_vm1, %v1820_v30, %v1822_v56  ;;  %v730_v25 = vrot.slane %v619_v51, 2 }
  0x96   : > { %v1126_v1 = vadd.f32 %v1035_v20, %v885_v41  ;;  %v2045_v55 = vpack.c.bf16 %v2231_v10, %v2231_v10  ;;  %v490_v9 = vsel %vm452_vm0, %v488_v16, %v489_v21  ;;  %v731_v63 = vrot.slane %v2967_v17, 2  ;;  %v3017_v41 = vld [vmem:[%s3721_s2] ss:$0 sm:$0xff] }
  0x97   : > { %v854_v35 = vmul.f32 %v2364_v6, %v2896_v50  ;;  %v579_v29 = vadd.f32 %v490_v9, %v305_v39  ;;  %v926_v31 = vmul.f32 %v2366_v7, %v2896_v50  ;;  %v927_v33 = vmul.f32 %v2366_v7, %v2912_v58 }
  0x98   : > { %v1367_v24 = vadd.f32 %v1276_v60, %v1126_v1  ;;  %2078 = vst.msk [vmem:[%s2495_s4 + $0x30] sm:$0xf] %vm2065_vm2, %v2045_v55  ;;  %v732_v30 = vsel %vm694_vm1, %v730_v25, %v731_v63  ;;  %v1167_v34 = vmul.f32 %v2373_v8, %v2896_v50  ;;  %v1168_v27 = vmul.f32 %v2373_v8, %v2912_v58 }
  0x99   : > { %v1401_v28 = vmul.f32 %v2377_v11, %v2979_v18  ;;  %v821_v2 = vadd.f32 %v732_v30, %v579_v29  ;;  %v1036_v40 = vrot.slane %v926_v31, 1  ;;  %v1037_v14 = vrot.slane %v927_v33, 1 }
  0x9a   : > { %v1432_v23 = vadd.f32 %v1400_v53, %v1367_v24  ;;  %v1277_v54 = vrot.slane %v1167_v34, 2  ;;  %v1278_v36 = vrot.slane %v1168_v27, 2  ;;  %v1473_v46 = vmul.f32 %v2379_v12, %v2979_v18 }
  0x9b   : > { %v1474_v15 = vmul.f32 %v2379_v12, %v2995_v26  ;;  %v886_v48 = vadd.f32 %v854_v35, %v821_v2  ;;  %v1038_v45 = vsel %vm452_vm0, %v1036_v40, %v1037_v14  ;;  %v1714_v52 = vmul.f32 %v2381_v13, %v2979_v18 }
  0x9c   : > { %v1673_v47 = vadd.f32 %v1582_v38, %v1432_v23  ;;  %v1279_v44 = vsel %vm694_vm1, %v1277_v54, %v1278_v36  ;;  %v1583_v20 = vrot.slane %v1473_v46, 1  ;;  %v1715_v49 = vmul.f32 %v2381_v13, %v2995_v26 }
  0x9d   : > { %v1584_v53 = vrot.slane %v1474_v15, 1  ;;  %v1127_v60 = vadd.f32 %v1038_v45, %v886_v48  ;;  %v1824_v61 = vrot.slane %v1714_v52, 2  ;;  %v306_v39 = vmul.f32 %v2358_v3, %v2829_v37 }
  0x9e   : > { %v1914_v42 = vadd.f32 %v1823_v22, %v1673_v47  ;;  %v1825_v57 = vrot.slane %v1715_v49, 2  ;;  %v379_v0 = vmul.f32 %v2360_v4, %v2860_v62  ;;  %v621_v43 = vmul.f32 %v2362_v5, %v2860_v62  ;;  %v3027_v22 = vld [vmem:[%s2371_s25 + $0xe8] sm:$0x3] }
  0x9f   : > { %v1585_v19 = vsel %vm452_vm0, %v1583_v20, %v1584_v53  ;;  %v1368_v56 = vadd.f32 %v1279_v44, %v1127_v60  ;;  %v855_v37 = vmul.f32 %v2364_v6, %v2912_v58  ;;  %v928_v51 = vmul.f32 %v2366_v7, %v2942_v32 }
  0xa0   : > { %vm1950_vm3 = vcmp.ge.f32.partialorder %v1914_v42, %v3017_v41  ;;  %v1826_v38 = vsel %vm694_vm1, %v1824_v61, %v1825_v57  ;;  %v491_v62 = vrot.slane %v379_v0, 1  ;;  %v733_v16 = vrot.slane %v621_v43, 2  ;;  %v3064_v61 = vld [vmem:[%s2371_s25 + $0xf0] sm:$0xff] }
  0xa1   : > { %v2232_v17 = vsel %vm1950_vm3, 1.0, %v2307_v59  ;;  %v1433_v1 = vadd.f32 %v1401_v28, %v1368_v56  ;;  %v1039_v25 = vrot.slane %v928_v51, 1  ;;  %v1169_v55 = vmul.f32 %v2373_v8, %v2942_v32 }
  0xa2   : > { %v2046_v10 = vpack.c.bf16 %v2232_v17, %v2232_v17  ;;  %v492_v9 = vsel %vm452_vm0, %v489_v21, %v491_v62  ;;  %v734_v35 = vsel %vm694_vm1, %v731_v63, %v733_v16  ;;  %v1402_v24 = vmul.f32 %v2377_v11, %v2995_v26  ;;  %v3080_v17 = vld [vmem:[%s2371_s25 + $0xf8] sm:$0xff] }
  0xa3   : > { %v1475_v29 = vmul.f32 %v2379_v12, %v3027_v22  ;;  %v1674_v31 = vadd.f32 %v1585_v19, %v1433_v1  ;;  %v580_v33 = vadd.f32 %v492_v9, %v306_v39  ;;  %v1040_v30 = vsel %vm452_vm0, %v1037_v14, %v1039_v25 }
  0xa4   : > { %2079 = vst.msk [vmem:[%s2495_s4 + $0x34] sm:$0xf] %vm2065_vm2, %v2046_v10  ;;  %v1280_v34 = vrot.slane %v1169_v55, 2  ;;  %v1716_v28 = vmul.f32 %v2381_v13, %v3027_v22  ;;  %v307_v21 = vmul.f32 %v2358_v3, %v2896_v50  ;;  %v380_v63 = vmul.f32 %v2360_v4, %v2896_v50 }
  0xa5   : > { %v1586_v27 = vrot.slane %v1475_v29, 1  ;;  %v1915_v23 = vadd.f32 %v1826_v38, %v1674_v31  ;;  %v822_v2 = vadd.f32 %v734_v35, %v580_v33  ;;  %v3049_v54 = vmul.f32 %v2360_v4, %v2912_v58 }
  0xa6   : > { %v1281_v40 = vsel %vm694_vm1, %v1278_v36, %v1280_v34  ;;  %v1827_v46 = vrot.slane %v1716_v28, 2  ;;  %v493_v15 = vrot.slane %v380_v63, 1  ;;  %v622_v47 = vmul.f32 %v2362_v5, %v2896_v50 }
  0xa7   : > { %v1587_v14 = vsel %vm452_vm0, %v1584_v53, %v1586_v27  ;;  %vm1951_vm4 = vcmp.ge.f32.partialorder %v1915_v23, %v3017_v41  ;;  %v887_v48 = vadd.f32 %v855_v37, %v822_v2  ;;  %v494_v45 = vrot.slane %v3049_v54, 1 }
  0xa8   : > { %v623_v36 = vmul.f32 %v2362_v5, %v2912_v58  ;;  %v2233_v52 = vsel %vm1951_vm4, 1.0, %v2307_v59  ;;  %v1828_v44 = vsel %vm694_vm1, %v1825_v57, %v1827_v46  ;;  %v735_v20 = vrot.slane %v622_v47, 2 }
  0xa9   : > { %v856_v53 = vmul.f32 %v2364_v6, %v2979_v18  ;;  %v2047_v49 = vpack.c.bf16 %v2233_v52, %v2233_v52  ;;  %v1128_v50 = vadd.f32 %v1040_v30, %v887_v48  ;;  %v495_v42 = vsel %vm452_vm0, %v493_v15, %v494_v45 }
  0xaa   : > { %v736_v60 = vrot.slane %v623_v36, 2  ;;  %v581_v39 = vadd.f32 %v495_v42, %v307_v21  ;;  %v929_v19 = vmul.f32 %v2366_v7, %v2979_v18  ;;  %v930_v0 = vmul.f32 %v2366_v7, %v2995_v26 }
  0xab   : > { %v1170_v57 = vmul.f32 %v2373_v8, %v2979_v18  ;;  %2080 = vst.msk [vmem:[%s2495_s4 + $0x38] sm:$0xf] %vm2065_vm2, %v2047_v49  ;;  %v1369_v43 = vadd.f32 %v1281_v40, %v1128_v50  ;;  %v1171_v37 = vmul.f32 %v2373_v8, %v2995_v26  ;;  %v1403_v51 = vmul.f32 %v2377_v11, %v3064_v61  ;;  %v3111_v50 = vld [vmem:[%s2371_s25 + $0x100] sm:$0x3] }
  0xac   : > { %v737_v56 = vsel %vm694_vm1, %v735_v20, %v736_v60  ;;  %v1041_v62 = vrot.slane %v929_v19, 1  ;;  %v1042_v16 = vrot.slane %v930_v0, 1  ;;  %v1476_v55 = vmul.f32 %v2379_v12, %v3064_v61 }
  0xad   : > { %v823_v38 = vadd.f32 %v737_v56, %v581_v39  ;;  %v1282_v10 = vrot.slane %v1170_v57, 2  ;;  %v1434_v1 = vadd.f32 %v1402_v24, %v1369_v43  ;;  %v1283_v25 = vrot.slane %v1171_v37, 2 }
  0xae   : > { %v1477_v9 = vmul.f32 %v2379_v12, %v3080_v17  ;;  %v1043_v29 = vsel %vm452_vm0, %v1041_v62, %v1042_v16  ;;  %v1717_v31 = vmul.f32 %v2381_v13, %v3064_v61  ;;  %v1718_v33 = vmul.f32 %v2381_v13, %v3080_v17 }
  0xaf   : > { %v888_v35 = vadd.f32 %v856_v53, %v823_v38  ;;  %v1675_v30 = vadd.f32 %v1587_v14, %v1434_v1  ;;  %v1284_v34 = vsel %vm694_vm1, %v1282_v10, %v1283_v25  ;;  %v1588_v24 = vrot.slane %v1476_v55, 1 }
  0xb0   : > { %v1589_v27 = vrot.slane %v1477_v9, 1  ;;  %v1829_v21 = vrot.slane %v1717_v31, 2  ;;  %v1830_v63 = vrot.slane %v1718_v33, 2  ;;  %v308_v23 = vmul.f32 %v2358_v3, %v2912_v58 }
  0xb1   : > { %v1129_v28 = vadd.f32 %v1043_v29, %v888_v35  ;;  %v1916_v2 = vadd.f32 %v1828_v44, %v1675_v30  ;;  %v382_v54 = vmul.f32 %v2360_v4, %v2942_v32  ;;  %v624_v14 = vmul.f32 %v2362_v5, %v2942_v32 }
  0xb2   : > { %v1590_v40 = vsel %vm452_vm0, %v1588_v24, %v1589_v27  ;;  %v1831_v15 = vsel %vm694_vm1, %v1829_v21, %v1830_v63  ;;  %v857_v47 = vmul.f32 %v2364_v6, %v2995_v26  ;;  %v931_v48 = vmul.f32 %v2366_v7, %v3027_v22 }
  0xb3   : > { %v1370_v46 = vadd.f32 %v1284_v34, %v1129_v28  ;;  %vm1952_vm5 = vcmp.ge.f32.partialorder %v1916_v2, %v3017_v41  ;;  %v496_v58 = vrot.slane %v382_v54, 1  ;;  %v738_v36 = vrot.slane %v624_v14, 2  ;;  %v3147_v2 = vld [vmem:[%s2371_s25 + $0x108] sm:$0xff] }
  0xb4   : > { %v1172_v52 = vmul.f32 %v2373_v8, %v3027_v22  ;;  %v2234_v44 = vsel %vm1952_vm5, 1.0, %v2307_v59  ;;  %v1044_v20 = vrot.slane %v931_v48, 1  ;;  %v1404_v53 = vmul.f32 %v2377_v11, %v3080_v17  ;;  %v3163_v48 = vld [vmem:[%s2371_s25 + $0x110] sm:$0xff] }
  0xb5   : > { %v1435_v32 = vadd.f32 %v1403_v51, %v1370_v46  ;;  %v2048_v49 = vpack.c.bf16 %v2234_v44, %v2234_v44  ;;  %v497_v42 = vsel %vm452_vm0, %v494_v45, %v496_v58  ;;  %v739_v39 = vsel %vm694_vm1, %v736_v60, %v738_v36 }
  0xb6   : > { %v1285_v19 = vrot.slane %v1172_v52, 2  ;;  %v582_v57 = vadd.f32 %v497_v42, %v308_v23  ;;  %v1045_v43 = vsel %vm452_vm0, %v1042_v16, %v1044_v20  ;;  %v1478_v56 = vmul.f32 %v2379_v12, %v3111_v50 }
  0xb7   : > { %v1676_v0 = vadd.f32 %v1590_v40, %v1435_v32  ;;  %2081 = vst.msk [vmem:[%s2495_s4 + $0x3c] sm:$0xf] %vm2065_vm2, %v2048_v49  ;;  %v1719_v51 = vmul.f32 %v2381_v13, %v3111_v50  ;;  %v309_v45 = vmul.f32 %v2358_v3, %v2979_v18  ;;  %v383_v60 = vmul.f32 %v2360_v4, %v2979_v18 }
  0xb8   : > { %v1286_v37 = vsel %vm694_vm1, %v1283_v25, %v1285_v19  ;;  %v824_v62 = vadd.f32 %v739_v39, %v582_v57  ;;  %v1591_v10 = vrot.slane %v1478_v56, 1  ;;  %v3129_v16 = vmul.f32 %v2360_v4, %v2995_v26 }
  0xb9   : > { %v1917_v38 = vadd.f32 %v1831_v15, %v1676_v0  ;;  %v1832_v1 = vrot.slane %v1719_v51, 2  ;;  %v498_v55 = vrot.slane %v383_v60, 1  ;;  %v625_v25 = vmul.f32 %v2362_v5, %v2979_v18 }
  0xba   : > { %v3135_v9 = vmul.f32 %v2362_v5, %v2995_v26  ;;  %v889_v35 = vadd.f32 %v857_v47, %v824_v62  ;;  %v1592_v29 = vsel %vm452_vm0, %v1589_v27, %v1591_v10  ;;  %v499_v31 = vrot.slane %v3129_v16, 1 }
  0xbb   : > { %vm1953_vm6 = vcmp.ge.f32.partialorder %v1917_v38, %v3017_v41  ;;  %v1833_v30 = vsel %vm694_vm1, %v1830_v63, %v1832_v1  ;;  %v740_v34 = vrot.slane %v625_v25, 2  ;;  %v858_v23 = vmul.f32 %v2364_v6, %v3064_v61 }
  0xbc   : > { %v2235_v33 = vsel %vm1953_vm6, 1.0, %v2307_v59  ;;  %v741_v18 = vrot.slane %v3135_v9, 2  ;;  %v1130_v28 = vadd.f32 %v1045_v43, %v889_v35  ;;  %v500_v21 = vsel %vm452_vm0, %v498_v55, %v499_v31 }
  0xbd   : > { %v2049_v24 = vpack.c.bf16 %v2235_v33, %v2235_v33  ;;  %v583_v27 = vadd.f32 %v500_v21, %v309_v45  ;;  %v932_v54 = vmul.f32 %v2366_v7, %v3064_v61  ;;  %v933_v63 = vmul.f32 %v2366_v7, %v3080_v17  ;;  %v3193_v21 = vld [vmem:[%s2371_s25 + $0x118] sm:$0x3] }
  0xbe   : > { %v742_v40 = vsel %vm694_vm1, %v740_v34, %v741_v18  ;;  %v1371_v14 = vadd.f32 %v1286_v37, %v1130_v28  ;;  %v1173_v46 = vmul.f32 %v2373_v8, %v3064_v61  ;;  %v1174_v15 = vmul.f32 %v2373_v8, %v3080_v17 }
  0xbf   : > { %2082 = vst.msk [vmem:[%s2495_s4 + $0x40] sm:$0xf] %vm2065_vm2, %v2049_v24  ;;  %v1405_v47 = vmul.f32 %v2377_v11, %v3147_v2  ;;  %v825_v58 = vadd.f32 %v742_v40, %v583_v27  ;;  %v1046_v36 = vrot.slane %v932_v54, 1  ;;  %v1047_v52 = vrot.slane %v933_v63, 1 }
  0xc0   : > { %v1479_v44 = vmul.f32 %v2379_v12, %v3147_v2  ;;  %v1436_v32 = vadd.f32 %v1404_v53, %v1371_v14  ;;  %v1287_v20 = vrot.slane %v1173_v46, 2  ;;  %v1288_v49 = vrot.slane %v1174_v15, 2 }
  0xc1   : > { %v1480_v42 = vmul.f32 %v2379_v12, %v3163_v48  ;;  %v890_v39 = vadd.f32 %v858_v23, %v825_v58  ;;  %v1048_v19 = vsel %vm452_vm0, %v1046_v36, %v1047_v52  ;;  %v1720_v57 = vmul.f32 %v2381_v13, %v3147_v2 }
  0xc2   : > { %v1593_v0 = vrot.slane %v1479_v44, 1  ;;  %v1677_v43 = vadd.f32 %v1592_v29, %v1436_v32  ;;  %v1289_v56 = vsel %vm694_vm1, %v1287_v20, %v1288_v49  ;;  %v1721_v51 = vmul.f32 %v2381_v13, %v3163_v48 }
  0xc3   : > { %v1594_v37 = vrot.slane %v1480_v42, 1  ;;  %v1131_v53 = vadd.f32 %v1048_v19, %v890_v39  ;;  %v1834_v45 = vrot.slane %v1720_v57, 2  ;;  %v310_v60 = vmul.f32 %v2358_v3, %v2995_v26 }
  0xc4   : > { %v385_v38 = vmul.f32 %v2360_v4, %v3027_v22  ;;  %v1918_v62 = vadd.f32 %v1833_v30, %v1677_v43  ;;  %v1835_v16 = vrot.slane %v1721_v51, 2  ;;  %v627_v1 = vmul.f32 %v2362_v5, %v3027_v22 }
  0xc5   : > { %v1595_v10 = vsel %vm452_vm0, %v1593_v0, %v1594_v37  ;;  %v1372_v55 = vadd.f32 %v1289_v56, %v1131_v53  ;;  %v859_v9 = vmul.f32 %v2364_v6, %v3080_v17  ;;  %v934_v35 = vmul.f32 %v2366_v7, %v3111_v50 }
  0xc6   : > { %v501_v25 = vrot.slane %v385_v38, 1  ;;  %vm1954_vm7 = vcmp.ge.f32.partialorder %v1918_v62, %v3017_v41  ;;  %v1836_v26 = vsel %vm694_vm1, %v1834_v45, %v1835_v16  ;;  %v743_v29 = vrot.slane %v627_v1, 2  ;;  %v3230_v38 = vld [vmem:[%s2371_s25 + $0x120] sm:$0xff] }
  0xc7   : > { %v1175_v33 = vmul.f32 %v2373_v8, %v3111_v50  ;;  %v2236_v30 = vsel %vm1954_vm7, 1.0, %v2307_v59  ;;  %v1437_v22 = vadd.f32 %v1405_v47, %v1372_v55  ;;  %v1049_v24 = vrot.slane %v934_v35, 1 }
  0xc8   : > { %v502_v34 = vsel %vm452_vm0, %v499_v31, %v501_v25  ;;  %v2050_v28 = vpack.c.bf16 %v2236_v30, %v2236_v30  ;;  %v744_v27 = vsel %vm694_vm1, %v741_v18, %v743_v29  ;;  %v1406_v14 = vmul.f32 %v2377_v11, %v3163_v48 }
  0xc9   : > { %v584_v23 = vadd.f32 %v502_v34, %v310_v60  ;;  %v1290_v40 = vrot.slane %v1175_v33, 2  ;;  %v1678_v54 = vadd.f32 %v1595_v10, %v1437_v22  ;;  %v1050_v63 = vsel %vm452_vm0, %v1047_v52, %v1049_v24 }
  0xca   : > { %v1481_v46 = vmul.f32 %v2379_v12, %v3193_v21  ;;  %2083 = vst.msk [vmem:[%s2495_s4 + $0x44] sm:$0xf] %vm2065_vm2, %v2050_v28  ;;  %v1722_v47 = vmul.f32 %v2381_v13, %v3193_v21  ;;  %v311_v18 = vmul.f32 %v2358_v3, %v3064_v61  ;;  %v386_v52 = vmul.f32 %v2360_v4, %v3064_v61 }
  0xcb   : > { %v826_v31 = vadd.f32 %v744_v27, %v584_v23  ;;  %v1291_v15 = vsel %vm694_vm1, %v1288_v49, %v1290_v40  ;;  %v1919_v58 = vadd.f32 %v1836_v26, %v1678_v54  ;;  %v3212_v44 = vmul.f32 %v2360_v4, %v3080_v17  ;;  %v3246_v26 = vld [vmem:[%s2371_s25 + $0x128] sm:$0xff] }
  0xcc   : > { %v1596_v36 = vrot.slane %v1481_v46, 1  ;;  %v1837_v20 = vrot.slane %v1722_v47, 2  ;;  %v628_v49 = vmul.f32 %v2362_v5, %v3064_v61  ;;  %v3218_v42 = vmul.f32 %v2362_v5, %v3080_v17 }
  0xcd   : > { %v891_v32 = vadd.f32 %v859_v9, %v826_v31  ;;  %vm1955_vm8 = vcmp.ge.f32.partialorder %v1919_v58, %v3017_v41  ;;  %v503_v19 = vrot.slane %v386_v52, 1  ;;  %v504_v0 = vrot.slane %v3212_v44, 1 }
  0xce   : > { %v1597_v39 = vsel %vm452_vm0, %v1594_v37, %v1596_v36  ;;  %v2237_v57 = vsel %vm1955_vm8, 1.0, %v2307_v59  ;;  %v1838_v56 = vsel %vm694_vm1, %v1835_v16, %v1837_v20  ;;  %v745_v51 = vrot.slane %v628_v49, 2 }
  0xcf   : > { %v1132_v43 = vadd.f32 %v1050_v63, %v891_v32  ;;  %v2051_v61 = vpack.c.bf16 %v2237_v57, %v2237_v57  ;;  %v505_v53 = vsel %vm452_vm0, %v503_v19, %v504_v0  ;;  %v746_v45 = vrot.slane %v3218_v42, 2 }
  0xd0   : > { %v860_v60 = vmul.f32 %v2364_v6, %v3147_v2  ;;  %v585_v62 = vadd.f32 %v505_v53, %v311_v18  ;;  %v935_v10 = vmul.f32 %v2366_v7, %v3147_v2  ;;  %v936_v16 = vmul.f32 %v2366_v7, %v3163_v48 }
  0xd1   : > { %v1373_v37 = vadd.f32 %v1291_v15, %v1132_v43  ;;  %2084 = vst.msk [vmem:[%s2495_s4 + $0x48] sm:$0xf] %vm2065_vm2, %v2051_v61  ;;  %v747_v1 = vsel %vm694_vm1, %v745_v51, %v746_v45  ;;  %v1176_v55 = vmul.f32 %v2373_v8, %v3147_v2  ;;  %v1177_v25 = vmul.f32 %v2373_v8, %v3163_v48  ;;  %v3273_v51 = vld [vmem:[%s2371_s25 + $0x130] sm:$0x3] }
  0xd2   : > { %v1407_v9 = vmul.f32 %v2377_v11, %v3230_v38  ;;  %v827_v29 = vadd.f32 %v747_v1, %v585_v62  ;;  %v1051_v33 = vrot.slane %v935_v10, 1  ;;  %v1052_v30 = vrot.slane %v936_v16, 1 }
  0xd3   : > { %v1438_v35 = vadd.f32 %v1406_v14, %v1373_v37  ;;  %v1292_v22 = vrot.slane %v1176_v55, 2  ;;  %v1293_v34 = vrot.slane %v1177_v25, 2  ;;  %v1482_v24 = vmul.f32 %v2379_v12, %v3230_v38 }
  0xd4   : > { %v1483_v28 = vmul.f32 %v2379_v12, %v3246_v26  ;;  %v892_v27 = vadd.f32 %v860_v60, %v827_v29  ;;  %v1053_v40 = vsel %vm452_vm0, %v1051_v33, %v1052_v30  ;;  %v1723_v54 = vmul.f32 %v2381_v13, %v3230_v38 }
  0xd5   : > { %v1679_v23 = vadd.f32 %v1597_v39, %v1438_v35  ;;  %v1294_v63 = vsel %vm694_vm1, %v1292_v22, %v1293_v34  ;;  %v1598_v14 = vrot.slane %v1482_v24, 1  ;;  %v1724_v31 = vmul.f32 %v2381_v13, %v3246_v26 }
  0xd6   : > { %v1599_v46 = vrot.slane %v1483_v28, 1  ;;  %v1133_v47 = vadd.f32 %v1053_v40, %v892_v27  ;;  %v1839_v18 = vrot.slane %v1723_v54, 2  ;;  %v312_v58 = vmul.f32 %v2358_v3, %v3080_v17 }
  0xd7   : > { %v1920_v15 = vadd.f32 %v1838_v56, %v1679_v23  ;;  %v1840_v52 = vrot.slane %v1724_v31, 2  ;;  %v388_v44 = vmul.f32 %v2360_v4, %v3111_v50  ;;  %v630_v32 = vmul.f32 %v2362_v5, %v3111_v50 }
  0xd8   : > { %v1600_v36 = vsel %vm452_vm0, %v1598_v14, %v1599_v46  ;;  %v1374_v20 = vadd.f32 %v1294_v63, %v1133_v47  ;;  %v861_v49 = vmul.f32 %v2364_v6, %v3163_v48  ;;  %v937_v42 = vmul.f32 %v2366_v7, %v3193_v21 }
  0xd9   : > { %vm1956_vm9 = vcmp.ge.f32.partialorder %v1920_v15, %v3017_v41  ;;  %v1841_v39 = vsel %vm694_vm1, %v1839_v18, %v1840_v52  ;;  %v506_v19 = vrot.slane %v388_v44, 1  ;;  %v748_v57 = vrot.slane %v630_v32, 2  ;;  %v3310_v18 = vld [vmem:[%s2371_s25 + $0x138] sm:$0xff] }
  0xda   : > { %v2238_v17 = vsel %vm1956_vm9, 1.0, %v2307_v59  ;;  %v1439_v56 = vadd.f32 %v1407_v9, %v1374_v20  ;;  %v1054_v50 = vrot.slane %v937_v42, 1  ;;  %v1178_v61 = vmul.f32 %v2373_v8, %v3193_v21 }
  0xdb   : > { %v2052_v43 = vpack.c.bf16 %v2238_v17, %v2238_v17  ;;  %v507_v53 = vsel %vm452_vm0, %v504_v0, %v506_v19  ;;  %v749_v60 = vsel %vm694_vm1, %v746_v45, %v748_v57  ;;  %v1408_v37 = vmul.f32 %v2377_v11, %v3246_v26  ;;  %v3326_v17 = vld [vmem:[%s2371_s25 + $0x140] sm:$0xff] }
  0xdc   : > { %v1484_v62 = vmul.f32 %v2379_v12, %v3273_v51  ;;  %v1680_v10 = vadd.f32 %v1600_v36, %v1439_v56  ;;  %v586_v16 = vadd.f32 %v507_v53, %v312_v58  ;;  %v1055_v1 = vsel %vm452_vm0, %v1052_v30, %v1054_v50 }
  0xdd   : > { %2085 = vst.msk [vmem:[%s2495_s4 + $0x4c] sm:$0xf] %vm2065_vm2, %v2052_v43  ;;  %v1295_v55 = vrot.slane %v1178_v61, 2  ;;  %v1725_v9 = vmul.f32 %v2381_v13, %v3273_v51  ;;  %v313_v0 = vmul.f32 %v2358_v3, %v3147_v2  ;;  %v389_v45 = vmul.f32 %v2360_v4, %v3147_v2 }
  0xde   : > { %v1601_v25 = vrot.slane %v1484_v62, 1  ;;  %v1921_v35 = vadd.f32 %v1841_v39, %v1680_v10  ;;  %v828_v29 = vadd.f32 %v749_v60, %v586_v16  ;;  %v3295_v22 = vmul.f32 %v2360_v4, %v3163_v48 }
  0xdf   : > { %v1296_v33 = vsel %vm694_vm1, %v1293_v34, %v1295_v55  ;;  %v1842_v24 = vrot.slane %v1725_v9, 2  ;;  %v508_v28 = vrot.slane %v389_v45, 1  ;;  %v631_v23 = vmul.f32 %v2362_v5, %v3147_v2 }
  0xe0   : > { %v1602_v30 = vsel %vm452_vm0, %v1599_v46, %v1601_v25  ;;  %vm1957_vm10 = vcmp.ge.f32.partialorder %v1921_v35, %v3017_v41  ;;  %v893_v27 = vadd.f32 %v861_v49, %v828_v29  ;;  %v509_v40 = vrot.slane %v3295_v22, 1 }
  0xe1   : > { %v632_v34 = vmul.f32 %v2362_v5, %v3163_v48  ;;  %v2239_v54 = vsel %vm1957_vm10, 1.0, %v2307_v59  ;;  %v1843_v63 = vsel %vm694_vm1, %v1840_v52, %v1842_v24  ;;  %v750_v14 = vrot.slane %v631_v23, 2 }
  0xe2   : > { %v862_v46 = vmul.f32 %v2364_v6, %v3230_v38  ;;  %v2053_v31 = vpack.c.bf16 %v2239_v54, %v2239_v54  ;;  %v1134_v2 = vadd.f32 %v1055_v1, %v893_v27  ;;  %v510_v15 = vsel %vm452_vm0, %v508_v28, %v509_v40 }
  0xe3   : > { %v751_v47 = vrot.slane %v632_v34, 2  ;;  %v587_v58 = vadd.f32 %v510_v15, %v313_v0  ;;  %v938_v36 = vmul.f32 %v2366_v7, %v3230_v38  ;;  %v939_v44 = vmul.f32 %v2366_v7, %v3246_v26 }
  0xe4   : > { %v1179_v52 = vmul.f32 %v2373_v8, %v3230_v38  ;;  %2086 = vst.msk [vmem:[%s2495_s4 + $0x50] sm:$0xf] %vm2065_vm2, %v2053_v31  ;;  %v1375_v32 = vadd.f32 %v1296_v33, %v1134_v2  ;;  %v1180_v49 = vmul.f32 %v2373_v8, %v3246_v26  ;;  %v1409_v42 = vmul.f32 %v2377_v11, %v3310_v18  ;;  %v3357_v2 = vld [vmem:[%s2371_s25 + $0x148] sm:$0x3] }
  0xe5   : > { %v752_v20 = vsel %vm694_vm1, %v750_v14, %v751_v47  ;;  %v1056_v19 = vrot.slane %v938_v36, 1  ;;  %v1057_v57 = vrot.slane %v939_v44, 1  ;;  %v1485_v61 = vmul.f32 %v2379_v12, %v3310_v18 }
  0xe6   : > { %v829_v39 = vadd.f32 %v752_v20, %v587_v58  ;;  %v1297_v43 = vrot.slane %v1179_v52, 2  ;;  %v1440_v56 = vadd.f32 %v1408_v37, %v1375_v32  ;;  %v1298_v50 = vrot.slane %v1180_v49, 2 }
  0xe7   : > { %v1486_v53 = vmul.f32 %v2379_v12, %v3326_v17  ;;  %v1058_v62 = vsel %vm452_vm0, %v1056_v19, %v1057_v57  ;;  %v1726_v10 = vmul.f32 %v2381_v13, %v3310_v18  ;;  %v1727_v16 = vmul.f32 %v2381_v13, %v3326_v17 }
  0xe8   : > { %v894_v60 = vadd.f32 %v862_v46, %v829_v39  ;;  %v1681_v1 = vadd.f32 %v1602_v30, %v1440_v56  ;;  %v1299_v55 = vsel %vm694_vm1, %v1297_v43, %v1298_v50  ;;  %v1603_v37 = vrot.slane %v1485_v61, 1 }
  0xe9   : > { %v1604_v25 = vrot.slane %v1486_v53, 1  ;;  %v1844_v0 = vrot.slane %v1726_v10, 2  ;;  %v1845_v45 = vrot.slane %v1727_v16, 2  ;;  %v314_v35 = vmul.f32 %v2358_v3, %v3163_v48 }
  0xea   : > { %v1135_v9 = vadd.f32 %v1058_v62, %v894_v60  ;;  %v1922_v29 = vadd.f32 %v1843_v63, %v1681_v1  ;;  %v391_v22 = vmul.f32 %v2360_v4, %v3193_v21  ;;  %v633_v30 = vmul.f32 %v2362_v5, %v3193_v21 }
  0xeb   : > { %v1605_v33 = vsel %vm452_vm0, %v1603_v37, %v1604_v25  ;;  %v1846_v28 = vsel %vm694_vm1, %v1844_v0, %v1845_v45  ;;  %v863_v23 = vmul.f32 %v2364_v6, %v3246_v26  ;;  %v940_v27 = vmul.f32 %v2366_v7, %v3273_v51 }
  0xec   : > { %v1376_v24 = vadd.f32 %v1299_v55, %v1135_v9  ;;  %vm1958_vm11 = vcmp.ge.f32.partialorder %v1922_v29, %v3017_v41  ;;  %v511_v48 = vrot.slane %v391_v22, 1  ;;  %v753_v34 = vrot.slane %v633_v30, 2  ;;  %v3393_v29 = vld [vmem:[%s2371_s25 + $0x150] sm:$0xff] }
  0xed   : > { %v1181_v54 = vmul.f32 %v2373_v8, %v3273_v51  ;;  %v2240_v63 = vsel %vm1958_vm11, 1.0, %v2307_v59  ;;  %v1059_v14 = vrot.slane %v940_v27, 1  ;;  %v1410_v46 = vmul.f32 %v2377_v11, %v3326_v17  ;;  %v3409_v27 = vld [vmem:[%s2371_s25 + $0x158] sm:$0xff] }
  0xee   : > { %v1441_v21 = vadd.f32 %v1409_v42, %v1376_v24  ;;  %v2054_v31 = vpack.c.bf16 %v2240_v63, %v2240_v63  ;;  %v512_v15 = vsel %vm452_vm0, %v509_v40, %v511_v48  ;;  %v754_v58 = vsel %vm694_vm1, %v751_v47, %v753_v34 }
  0xef   : > { %v1300_v36 = vrot.slane %v1181_v54, 2  ;;  %v588_v52 = vadd.f32 %v512_v15, %v314_v35  ;;  %v1060_v32 = vsel %vm452_vm0, %v1057_v57, %v1059_v14  ;;  %v1487_v20 = vmul.f32 %v2379_v12, %v3357_v2 }
  0xf0   : > { %v1682_v44 = vadd.f32 %v1605_v33, %v1441_v21  ;;  %2087 = vst.msk [vmem:[%s2495_s4 + $0x54] sm:$0xf] %vm2065_vm2, %v2054_v31  ;;  %v1728_v42 = vmul.f32 %v2381_v13, %v3357_v2  ;;  %v315_v40 = vmul.f32 %v2358_v3, %v3230_v38  ;;  %v392_v47 = vmul.f32 %v2360_v4, %v3230_v38 }
  0xf1   : > { %v1301_v49 = vsel %vm694_vm1, %v1298_v50, %v1300_v36  ;;  %v830_v19 = vadd.f32 %v754_v58, %v588_v52  ;;  %v1606_v43 = vrot.slane %v1487_v20, 1  ;;  %v3375_v57 = vmul.f32 %v2360_v4, %v3246_v26 }
  0xf2   : > { %v1923_v39 = vadd.f32 %v1846_v28, %v1682_v44  ;;  %v1847_v56 = vrot.slane %v1728_v42, 2  ;;  %v513_v61 = vrot.slane %v392_v47, 1  ;;  %v634_v50 = vmul.f32 %v2362_v5, %v3230_v38 }
  0xf3   : > { %v3381_v53 = vmul.f32 %v2362_v5, %v3246_v26  ;;  %v895_v60 = vadd.f32 %v863_v23, %v830_v19  ;;  %v1607_v62 = vsel %vm452_vm0, %v1604_v25, %v1606_v43  ;;  %v514_v10 = vrot.slane %v3375_v57, 1 }
  0xf4   : > { %vm1959_vm12 = vcmp.ge.f32.partialorder %v1923_v39, %v3017_v41  ;;  %v1848_v1 = vsel %vm694_vm1, %v1845_v45, %v1847_v56  ;;  %v755_v55 = vrot.slane %v634_v50, 2  ;;  %v864_v35 = vmul.f32 %v2364_v6, %v3310_v18 }
  0xf5   : > { %v2241_v16 = vsel %vm1959_vm12, 1.0, %v2307_v59  ;;  %v756_v38 = vrot.slane %v3381_v53, 2  ;;  %v1136_v9 = vadd.f32 %v1060_v32, %v895_v60  ;;  %v515_v0 = vsel %vm452_vm0, %v513_v61, %v514_v10 }
  0xf6   : > { %v2055_v37 = vpack.c.bf16 %v2241_v16, %v2241_v16  ;;  %v589_v25 = vadd.f32 %v515_v0, %v315_v40  ;;  %v941_v22 = vmul.f32 %v2366_v7, %v3310_v18  ;;  %v942_v45 = vmul.f32 %v2366_v7, %v3326_v17  ;;  %v3439_v0 = vld [vmem:[%s2371_s25 + $0x160] sm:$0x3] }
  0xf7   : > { %v757_v33 = vsel %vm694_vm1, %v755_v55, %v756_v38  ;;  %v1377_v30 = vadd.f32 %v1301_v49, %v1136_v9  ;;  %v1182_v24 = vmul.f32 %v2373_v8, %v3310_v18  ;;  %v1183_v28 = vmul.f32 %v2373_v8, %v3326_v17 }
  0xf8   : > { %2088 = vst.msk [vmem:[%s2495_s4 + $0x58] sm:$0xf] %vm2065_vm2, %v2055_v37  ;;  %v1411_v23 = vmul.f32 %v2377_v11, %v3393_v29  ;;  %v831_v48 = vadd.f32 %v757_v33, %v589_v25  ;;  %v1061_v34 = vrot.slane %v941_v22, 1  ;;  %v1062_v54 = vrot.slane %v942_v45, 1 }
  0xf9   : > { %v1488_v63 = vmul.f32 %v2379_v12, %v3393_v29  ;;  %v1442_v21 = vadd.f32 %v1410_v46, %v1377_v30  ;;  %v1302_v14 = vrot.slane %v1182_v24, 2  ;;  %v1303_v31 = vrot.slane %v1183_v28, 2 }
  0xfa   : > { %v1489_v15 = vmul.f32 %v2379_v12, %v3409_v27  ;;  %v896_v58 = vadd.f32 %v864_v35, %v831_v48  ;;  %v1063_v36 = vsel %vm452_vm0, %v1061_v34, %v1062_v54  ;;  %v1729_v52 = vmul.f32 %v2381_v13, %v3393_v29 }
  0xfb   : > { %v1608_v44 = vrot.slane %v1488_v63, 1  ;;  %v1683_v32 = vadd.f32 %v1607_v62, %v1442_v21  ;;  %v1304_v20 = vsel %vm694_vm1, %v1302_v14, %v1303_v31  ;;  %v1730_v42 = vmul.f32 %v2381_v13, %v3409_v27 }
  0xfc   : > { %v1609_v49 = vrot.slane %v1489_v15, 1  ;;  %v1137_v46 = vadd.f32 %v1063_v36, %v896_v58  ;;  %v1849_v40 = vrot.slane %v1729_v52, 2  ;;  %v316_v47 = vmul.f32 %v2358_v3, %v3246_v26 }
  0xfd   : > { %v394_v39 = vmul.f32 %v2360_v4, %v3273_v51  ;;  %v1924_v19 = vadd.f32 %v1848_v1, %v1683_v32  ;;  %v1850_v57 = vrot.slane %v1730_v42, 2  ;;  %v636_v56 = vmul.f32 %v2362_v5, %v3273_v51 }
  0xfe   : > { %v1610_v43 = vsel %vm452_vm0, %v1608_v44, %v1609_v49  ;;  %v1378_v61 = vadd.f32 %v1304_v20, %v1137_v46  ;;  %v865_v53 = vmul.f32 %v2364_v6, %v3326_v17  ;;  %v943_v60 = vmul.f32 %v2366_v7, %v3357_v2 }
  0xff   : > { %v516_v50 = vrot.slane %v394_v39, 1  ;;  %vm1960_vm13 = vcmp.ge.f32.partialorder %v1924_v19, %v3017_v41  ;;  %v1851_v26 = vsel %vm694_vm1, %v1849_v40, %v1850_v57  ;;  %v758_v62 = vrot.slane %v636_v56, 2 }
 0x100   : > { %v1184_v16 = vmul.f32 %v2373_v8, %v3357_v2  ;;  %v2242_v1 = vsel %vm1960_vm13, 1.0, %v2307_v59  ;;  %v1443_v51 = vadd.f32 %v1411_v23, %v1378_v61  ;;  %v1064_v37 = vrot.slane %v943_v60, 1  ;;  %v3487_v60 = vld [vmem:[%s2371_s25 + $0x168] sm:$0xff] }
 0x101   : > { %v517_v55 = vsel %vm452_vm0, %v514_v10, %v516_v50  ;;  %v2056_v9 = vpack.c.bf16 %v2242_v1, %v2242_v1  ;;  %v759_v25 = vsel %vm694_vm1, %v756_v38, %v758_v62  ;;  %v1490_v30 = vmul.f32 %v2379_v12, %v3439_v0 }
 0x102   : > { %v590_v35 = vadd.f32 %v517_v55, %v316_v47  ;;  %v1305_v33 = vrot.slane %v1184_v16, 2  ;;  %v1684_v22 = vadd.f32 %v1610_v43, %v1443_v51  ;;  %v1065_v45 = vsel %vm452_vm0, %v1062_v54, %v1064_v37 }
 0x103   : > { %2089 = vst.msk [vmem:[%s2495_s4 + $0x5c] sm:$0xf] %vm2065_vm2, %v2056_v9  ;;  %v1412_v10 = vmul.f32 %v2377_v11, %v3409_v27  ;;  %v1731_v23 = vmul.f32 %v2381_v13, %v3439_v0  ;;  %v1611_v38 = vrot.slane %v1490_v30, 1  ;;  %v395_v34 = vmul.f32 %v2360_v4, %v3310_v18 }
 0x104   : > { %v832_v24 = vadd.f32 %v759_v25, %v590_v35  ;;  %v1306_v28 = vsel %vm694_vm1, %v1303_v31, %v1305_v33  ;;  %v1925_v48 = vadd.f32 %v1851_v26, %v1684_v22  ;;  %v3456_v54 = vmul.f32 %v2360_v4, %v3326_v17  ;;  %v3490_v26 = vld [vmem:[%s2371_s25 + $0x170] sm:$0xff] }
 0x105   : > { %v317_v21 = vmul.f32 %v2358_v3, %v3310_v18  ;;  %v637_v14 = vmul.f32 %v2362_v5, %v3310_v18  ;;  %v3464_v31 = vmul.f32 %v2362_v5, %v3326_v17  ;;  %v1852_v15 = vrot.slane %v1731_v23, 2 }
 0x106   : > { %v897_v63 = vadd.f32 %v865_v53, %v832_v24  ;;  %vm1961_vm14 = vcmp.ge.f32.partialorder %v1925_v48, %v3017_v41  ;;  %v518_v58 = vrot.slane %v395_v34, 1  ;;  %v519_v36 = vrot.slane %v3456_v54, 1 }
 0x107   : > { %v2243_v44 = vsel %vm1961_vm14, 1.0, %v2307_v59  ;;  %v1612_v32 = vsel %vm452_vm0, %v1609_v49, %v1611_v38  ;;  %v760_v20 = vrot.slane %v637_v14, 2  ;;  %v761_v46 = vrot.slane %v3464_v31, 2 }
 0x108   : > { %v1138_v52 = vadd.f32 %v1065_v45, %v897_v63  ;;  %v2057_v18 = vpack.c.bf16 %v2243_v44, %v2243_v44  ;;  %v520_v42 = vsel %vm452_vm0, %v518_v58, %v519_v36  ;;  %v866_v40 = vmul.f32 %v2364_v6, %v3393_v29 }
 0x109   : > { %v591_v39 = vadd.f32 %v520_v42, %v317_v21  ;;  %v944_v19 = vmul.f32 %v2366_v7, %v3393_v29  ;;  %v945_v43 = vmul.f32 %v2366_v7, %v3409_v27  ;;  %v1853_v49 = vsel %vm694_vm1, %v1850_v57, %v1852_v15 }
 0x10a   : > { %v1379_v47 = vadd.f32 %v1306_v28, %v1138_v52  ;;  %2090 = vst.msk [vmem:[%s2495_s4 + $0x60] sm:$0xf] %vm2065_vm2, %v2057_v18  ;;  %v762_v56 = vsel %vm694_vm1, %v760_v20, %v761_v46  ;;  %v1185_v61 = vmul.f32 %v2373_v8, %v3393_v29  ;;  %v1186_v50 = vmul.f32 %v2373_v8, %v3409_v27  ;;  %v3521_v20 = vld [vmem:[%s2371_s25 + $0x178] sm:$0x3] }
 0x10b   : > { %v833_v62 = vadd.f32 %v762_v56, %v591_v39  ;;  %v1066_v16 = vrot.slane %v944_v19, 1  ;;  %v1067_v1 = vrot.slane %v945_v43, 1  ;;  %v1491_v57 = vmul.f32 %v2379_v12, %v3487_v60 }
 0x10c   : > { %v1444_v53 = vadd.f32 %v1412_v10, %v1379_v47  ;;  %v1307_v51 = vrot.slane %v1185_v61, 2  ;;  %v1308_v55 = vrot.slane %v1186_v50, 2  ;;  %v1492_v37 = vmul.f32 %v2379_v12, %v3490_v26 }
 0x10d   : > { %v898_v35 = vadd.f32 %v866_v40, %v833_v62  ;;  %v1068_v25 = vsel %vm452_vm0, %v1066_v16, %v1067_v1  ;;  %v1732_v33 = vmul.f32 %v2381_v13, %v3487_v60  ;;  %v1613_v45 = vrot.slane %v1491_v57, 1 }
 0x10e   : > { %v1685_v9 = vadd.f32 %v1612_v32, %v1444_v53  ;;  %v1309_v22 = vsel %vm694_vm1, %v1307_v51, %v1308_v55  ;;  %v1614_v30 = vrot.slane %v1492_v37, 1  ;;  %v3502_v24 = vmul.f32 %v2381_v13, %v3490_v26 }
 0x10f   : > { %v1139_v10 = vadd.f32 %v1068_v25, %v898_v35  ;;  %v1413_v23 = vmul.f32 %v2377_v11, %v3487_v60  ;;  %v1854_v48 = vrot.slane %v1732_v33, 2  ;;  %v318_v34 = vmul.f32 %v2358_v3, %v3326_v17 }
 0x110   : > { %v1926_v28 = vadd.f32 %v1853_v49, %v1685_v9  ;;  %v1855_v38 = vrot.slane %v3502_v24, 2  ;;  %v397_v54 = vmul.f32 %v2360_v4, %v3357_v2  ;;  %v639_v63 = vmul.f32 %v2362_v5, %v3357_v2  ;;  %v3551_v9 = vld [vmem:[%s3721_s2] ss:$0 sm:$0xff] }
 0x111   : > { %v1380_v21 = vadd.f32 %v1309_v22, %v1139_v10  ;;  %v1615_v14 = vsel %vm452_vm0, %v1613_v45, %v1614_v30  ;;  %v946_v31 = vmul.f32 %v2366_v7, %v3439_v0  ;;  %v867_v17 = vmul.f32 %v2364_v6, %v3409_v27 }
 0x112   : > { %vm1962_vm15 = vcmp.ge.f32.partialorder %v1926_v28, %v3017_v41  ;;  %v521_v58 = vrot.slane %v397_v54, 1  ;;  %v763_v44 = vrot.slane %v639_v63, 2  ;;  %v1187_v41 = vmul.f32 %v2373_v8, %v3439_v0 }
 0x113   : > { %v2244_v15 = vsel %vm1962_vm15, 1.0, %v2307_v59  ;;  %v1445_v32 = vadd.f32 %v1413_v23, %v1380_v21  ;;  %v1069_v2 = vrot.slane %v946_v31, 1  ;;  %v1856_v18 = vsel %vm694_vm1, %v1854_v48, %v1855_v38 }
 0x114   : > { %v2058_v52 = vpack.c.bf16 %v2244_v15, %v2244_v15  ;;  %v522_v42 = vsel %vm452_vm0, %v519_v36, %v521_v58  ;;  %v764_v40 = vsel %vm694_vm1, %v761_v46, %v763_v44  ;;  %v1493_v47 = vmul.f32 %v2379_v12, %v3521_v20  ;;  %v3575_v15 = vld [vmem:[%s2371_s25 + $0x180] sm:$0xff]  ;;  %v3578_v58 = vld [vmem:[%s2371_s25 + $0x188] sm:$0xff] }
 0x115   : > { %v1686_v39 = vadd.f32 %v1615_v14, %v1445_v32  ;;  %v592_v19 = vadd.f32 %v522_v42, %v318_v34  ;;  %v1310_v43 = vrot.slane %v1187_v41, 2  ;;  %v1414_v49 = vmul.f32 %v2377_v11, %v3490_v26 }
 0x116   : > { %2091 = vst.msk [vmem:[%s2495_s4 + $0x64] sm:$0xf] %vm2065_vm2, %v2058_v52  ;;  %v1070_v56 = vsel %vm452_vm0, %v1067_v1, %v1069_v2  ;;  %v1616_v61 = vrot.slane %v1493_v47, 1  ;;  %v1734_v50 = vmul.f32 %v2381_v13, %v3521_v20  ;;  %v398_v36 = vmul.f32 %v2360_v4, %v3393_v29 }
 0x117   : > { %v1927_v46 = vadd.f32 %v1856_v18, %v1686_v39  ;;  %v834_v53 = vadd.f32 %v764_v40, %v592_v19  ;;  %v319_v62 = vmul.f32 %v2358_v3, %v3393_v29  ;;  %v3543_v16 = vmul.f32 %v2360_v4, %v3409_v27 }
 0x118   : > { %v1311_v51 = vsel %vm694_vm1, %v1308_v55, %v1310_v43  ;;  %v1857_v57 = vrot.slane %v1734_v50, 2  ;;  %v523_v1 = vrot.slane %v398_v36, 1  ;;  %v640_v37 = vmul.f32 %v2362_v5, %v3393_v29 }
 0x119   : > { %vm1963_vm3 = vcmp.ge.f32.partialorder %v1927_v46, %v3551_v9  ;;  %v899_v35 = vadd.f32 %v867_v17, %v834_v53  ;;  %v524_v25 = vrot.slane %v3543_v16, 1  ;;  %v641_v33 = vmul.f32 %v2362_v5, %v3409_v27 }
 0x11a   : > { %v2245_v55 = vsel %vm1963_vm3, 1.0, %v2307_v59  ;;  %v1617_v22 = vsel %vm452_vm0, %v1614_v30, %v1616_v61  ;;  %v765_v29 = vrot.slane %v640_v37, 2  ;;  %v868_v45 = vmul.f32 %v2364_v6, %v3487_v60 }
 0x11b   : > { %v2059_v24 = vpack.c.bf16 %v2245_v55, %v2245_v55  ;;  %v1140_v28 = vadd.f32 %v1070_v56, %v899_v35  ;;  %v525_v10 = vsel %vm452_vm0, %v523_v1, %v524_v25  ;;  %v766_v23 = vrot.slane %v641_v33, 2 }
 0x11c   : > { %v593_v48 = vadd.f32 %v525_v10, %v319_v62  ;;  %v947_v34 = vmul.f32 %v2366_v7, %v3487_v60  ;;  %v948_v54 = vmul.f32 %v2366_v7, %v3490_v26  ;;  %v1188_v30 = vmul.f32 %v2373_v8, %v3487_v60 }
 0x11d   : > { %2092 = vst.msk [vmem:[%s2495_s4 + $0x68] sm:$0xf] %vm2065_vm2, %v2059_v24  ;;  %v1381_v63 = vadd.f32 %v1311_v51, %v1140_v28  ;;  %v1858_v21 = vsel %vm694_vm1, %v1855_v38, %v1857_v57  ;;  %v767_v14 = vsel %vm694_vm1, %v765_v29, %v766_v23  ;;  %v1189_v31 = vmul.f32 %v2373_v8, %v3490_v26  ;;  %v3612_v28 = vld [vmem:[%s2371_s25 + $0x190] sm:$0x3] }
 0x11e   : > { %v835_v44 = vadd.f32 %v767_v14, %v593_v48  ;;  %v1071_v17 = vrot.slane %v947_v34, 1  ;;  %v1072_v52 = vrot.slane %v948_v54, 1  ;;  %v1312_v32 = vrot.slane %v1188_v30, 2 }
 0x11f   : > { %v1446_v2 = vadd.f32 %v1414_v49, %v1381_v63  ;;  %v1313_v41 = vrot.slane %v1189_v31, 2  ;;  %v1494_v18 = vmul.f32 %v2379_v12, %v3575_v15  ;;  %v1495_v38 = vmul.f32 %v2379_v12, %v3578_v58 }
 0x120   : > { %v900_v42 = vadd.f32 %v868_v45, %v835_v44  ;;  %v1073_v40 = vsel %vm452_vm0, %v1071_v17, %v1072_v52  ;;  %v1735_v47 = vmul.f32 %v2381_v13, %v3575_v15  ;;  %v3589_v39 = vmul.f32 %v2381_v13, %v3578_v58 }
 0x121   : > { %v1687_v19 = vadd.f32 %v1617_v22, %v1446_v2  ;;  %v1314_v43 = vsel %vm694_vm1, %v1312_v32, %v1313_v41  ;;  %v1618_v49 = vrot.slane %v1494_v18, 1  ;;  %v1619_v56 = vrot.slane %v1495_v38, 1 }
 0x122   : > { %v1141_v61 = vadd.f32 %v1073_v40, %v900_v42  ;;  %v1415_v50 = vmul.f32 %v2377_v11, %v3575_v15  ;;  %v1859_v36 = vrot.slane %v1735_v47, 2  ;;  %v1860_v46 = vrot.slane %v3589_v39, 2 }
 0x123   : > { %v1928_v53 = vadd.f32 %v1858_v21, %v1687_v19  ;;  %v320_v62 = vmul.f32 %v2358_v3, %v3409_v27  ;;  %v400_v16 = vmul.f32 %v2360_v4, %v3439_v0  ;;  %v642_v51 = vmul.f32 %v2362_v5, %v3439_v0 }
 0x124   : > { %v1382_v57 = vadd.f32 %v1314_v43, %v1141_v61  ;;  %v1620_v1 = vsel %vm452_vm0, %v1618_v49, %v1619_v56  ;;  %v1861_v37 = vsel %vm694_vm1, %v1859_v36, %v1860_v46  ;;  %v949_v35 = vmul.f32 %v2366_v7, %v3521_v20 }
 0x125   : > { %vm1964_vm4 = vcmp.ge.f32.partialorder %v1928_v53, %v3551_v9  ;;  %v526_v33 = vrot.slane %v400_v16, 1  ;;  %v768_v27 = vrot.slane %v642_v51, 2  ;;  %v1190_v55 = vmul.f32 %v2373_v8, %v3521_v20 }
 0x126   : > { %v2246_v22 = vsel %vm1964_vm4, 1.0, %v2307_v59  ;;  %v1447_v29 = vadd.f32 %v1415_v50, %v1382_v57  ;;  %v869_v0 = vmul.f32 %v2364_v6, %v3490_v26  ;;  %v1074_v45 = vrot.slane %v949_v35, 1  ;;  %v284_v50 = vld [vmem:[%s2371_s25 + $0x198] sm:$0xff] }
 0x127   : > { %v2060_v24 = vpack.c.bf16 %v2246_v22, %v2246_v22  ;;  %v527_v10 = vsel %vm452_vm0, %v524_v25, %v526_v33  ;;  %v769_v48 = vsel %vm694_vm1, %v766_v23, %v768_v27  ;;  %v1315_v34 = vrot.slane %v1190_v55, 2 }
 0x128   : > { %v1688_v54 = vadd.f32 %v1620_v1, %v1447_v29  ;;  %v594_v30 = vadd.f32 %v527_v10, %v320_v62  ;;  %v1416_v63 = vmul.f32 %v2377_v11, %v3578_v58  ;;  %v1496_v21 = vmul.f32 %v2379_v12, %v3612_v28  ;;  %v3650_v62 = vld [vmem:[%s2371_s25 + $0x1a0] sm:$0xff] }
 0x129   : > { %2093 = vst.msk [vmem:[%s2495_s4 + $0x6c] sm:$0xf] %vm2065_vm2, %v2060_v24  ;;  %v1075_v14 = vsel %vm452_vm0, %v1072_v52, %v1074_v45  ;;  %v1316_v31 = vsel %vm694_vm1, %v1313_v41, %v1315_v34  ;;  %v1737_v25 = vmul.f32 %v2381_v13, %v3612_v28  ;;  %v401_v23 = vmul.f32 %v2360_v4, %v3487_v60 }
 0x12a   : > { %v1929_v44 = vadd.f32 %v1861_v37, %v1688_v54  ;;  %v836_v17 = vadd.f32 %v769_v48, %v594_v30  ;;  %v1621_v32 = vrot.slane %v1496_v21, 1  ;;  %v3630_v2 = vmul.f32 %v2360_v4, %v3490_v26 }
 0x12b   : > { %v321_v18 = vmul.f32 %v2358_v3, %v3487_v60  ;;  %v528_v52 = vrot.slane %v401_v23, 1  ;;  %v643_v41 = vmul.f32 %v2362_v5, %v3487_v60  ;;  %v3638_v38 = vmul.f32 %v2362_v5, %v3490_v26 }
 0x12c   : > { %vm1965_vm5 = vcmp.ge.f32.partialorder %v1929_v44, %v3551_v9  ;;  %v901_v42 = vadd.f32 %v869_v0, %v836_v17  ;;  %v1862_v40 = vrot.slane %v1737_v25, 2  ;;  %v529_v47 = vrot.slane %v3630_v2, 1 }
 0x12d   : > { %v2247_v39 = vsel %vm1965_vm5, 1.0, %v2307_v59  ;;  %v1622_v19 = vsel %vm452_vm0, %v1619_v56, %v1621_v32  ;;  %v770_v43 = vrot.slane %v643_v41, 2  ;;  %v771_v49 = vrot.slane %v3638_v38, 2 }
 0x12e   : > { %v2061_v61 = vpack.c.bf16 %v2247_v39, %v2247_v39  ;;  %v1142_v60 = vadd.f32 %v1075_v14, %v901_v42  ;;  %v530_v36 = vsel %vm452_vm0, %v528_v52, %v529_v47  ;;  %v870_v53 = vmul.f32 %v2364_v6, %v3575_v15  ;;  %v286_v42 = vld [vmem:[%s2371_s25 + $0x1a8] sm:$0x3] }
 0x12f   : > { %v595_v16 = vadd.f32 %v530_v36, %v321_v18  ;;  %v772_v51 = vsel %vm694_vm1, %v770_v43, %v771_v49  ;;  %v950_v57 = vmul.f32 %v2366_v7, %v3575_v15  ;;  %v951_v56 = vmul.f32 %v2366_v7, %v3578_v58 }
 0x130   : > { %2094 = vst.msk [vmem:[%s2495_s4 + $0x70] sm:$0xf] %vm2065_vm2, %v2061_v61  ;;  %v1383_v1 = vadd.f32 %v1316_v31, %v1142_v60  ;;  %v1863_v37 = vsel %vm694_vm1, %v1860_v46, %v1862_v40  ;;  %v1191_v35 = vmul.f32 %v2373_v8, %v3575_v15  ;;  %v1192_v33 = vmul.f32 %v2373_v8, %v3578_v58 }
 0x131   : > { %v837_v27 = vadd.f32 %v772_v51, %v595_v16  ;;  %v1076_v55 = vrot.slane %v950_v57, 1  ;;  %v1077_v22 = vrot.slane %v951_v56, 1  ;;  %v1497_v29 = vmul.f32 %v2379_v12, %v284_v50 }
 0x132   : > { %v1448_v0 = vadd.f32 %v1416_v63, %v1383_v1  ;;  %v1317_v45 = vrot.slane %v1191_v35, 2  ;;  %v1318_v24 = vrot.slane %v1192_v33, 2  ;;  %v1498_v10 = vmul.f32 %v2379_v12, %v3650_v62 }
 0x133   : > { %v902_v48 = vadd.f32 %v870_v53, %v837_v27  ;;  %v1078_v46 = vsel %vm452_vm0, %v1076_v55, %v1077_v22  ;;  %v1623_v34 = vrot.slane %v1497_v29, 1  ;;  %v1738_v15 = vmul.f32 %v2381_v13, %v284_v50 }
 0x134   : > { %v1689_v54 = vadd.f32 %v1622_v19, %v1448_v0  ;;  %v1319_v30 = vsel %vm694_vm1, %v1317_v45, %v1318_v24  ;;  %v1624_v21 = vrot.slane %v1498_v10, 1  ;;  %v1739_v14 = vmul.f32 %v2381_v13, %v3650_v62 }
 0x135   : > { %v1143_v63 = vadd.f32 %v1078_v46, %v902_v48  ;;  %v1417_v31 = vmul.f32 %v2377_v11, %v284_v50  ;;  %v1864_v25 = vrot.slane %v1738_v15, 2  ;;  %v403_v23 = vmul.f32 %v2360_v4, %v3521_v20 }
 0x136   : > { %v1930_v44 = vadd.f32 %v1863_v37, %v1689_v54  ;;  %v1865_v17 = vrot.slane %v1739_v14, 2  ;;  %v322_v32 = vmul.f32 %v2358_v3, %v3490_v26  ;;  %v645_v2 = vmul.f32 %v2362_v5, %v3521_v20 }
 0x137   : > { %v1384_v18 = vadd.f32 %v1319_v30, %v1143_v63  ;;  %v1625_v52 = vsel %vm452_vm0, %v1623_v34, %v1624_v21  ;;  %v531_v41 = vrot.slane %v403_v23, 1  ;;  %v952_v38 = vmul.f32 %v2366_v7, %v3612_v28 }
 0x138   : > { %vm1966_vm6 = vcmp.ge.f32.partialorder %v1930_v44, %v3551_v9  ;;  %v773_v4 = vrot.slane %v645_v2, 2  ;;  %v871_v40 = vmul.f32 %v2364_v6, %v3578_v58  ;;  %v1193_v3 = vmul.f32 %v2373_v8, %v3612_v28 }
 0x139   : > { %v2248_v5 = vsel %vm1966_vm6, 1.0, %v2307_v59  ;;  %v1449_v26 = vadd.f32 %v1417_v31, %v1384_v18  ;;  %v532_v20 = vsel %vm452_vm0, %v529_v47, %v531_v41  ;;  %v1079_v39 = vrot.slane %v952_v38, 1 }
 0x13a   : > { %v2062_v19 = vpack.c.bf16 %v2248_v5, %v2248_v5  ;;  %v1866_v7 = vsel %vm694_vm1, %v1864_v25, %v1865_v17  ;;  %v596_v43 = vadd.f32 %v532_v20, %v322_v32  ;;  %v774_v61 = vsel %vm694_vm1, %v771_v49, %v773_v4 }
 0x13b   : > { %v1690_v60 = vadd.f32 %v1625_v52, %v1449_v26  ;;  %v1320_v50 = vrot.slane %v1193_v3, 2  ;;  %v1499_v36 = vmul.f32 %v2379_v12, %v286_v42  ;;  %v1080_v58 = vsel %vm452_vm0, %v1077_v22, %v1079_v39 }
 0x13c   : > { %2095 = vst.msk [vmem:[%s2495_s4 + $0x74] sm:$0xf] %vm2065_vm2, %v2062_v19  ;;  %v838_v6 = vadd.f32 %v774_v61, %v596_v43  ;;  %v1740_v28 = vmul.f32 %v2381_v13, %v286_v42  ;;  %v1418_v12 = vmul.f32 %v2377_v11, %v3650_v62 }
 0x13d   : > { %v1931_v8 = vadd.f32 %v1866_v7, %v1690_v60  ;;  %v1321_v53 = vsel %vm694_vm1, %v1318_v24, %v1320_v50  ;;  %v1626_v16 = vrot.slane %v1499_v36, 1 }
 0x13e   : > { %v903_v47 = vadd.f32 %v871_v40, %v838_v6  ;;  %v1867_v56 = vrot.slane %v1740_v28, 2 }
 0x13f   : > { %vm1967_vm7 = vcmp.ge.f32.partialorder %v1931_v8, %v3551_v9  ;;  %v1627_v13 = vsel %vm452_vm0, %v1624_v21, %v1626_v16 }
 0x140   : > { %v2249_v49 = vsel %vm1967_vm7, 1.0, %v2307_v59  ;;  %v1144_v51 = vadd.f32 %v1080_v58, %v903_v47  ;;  %v1868_v35 = vsel %vm694_vm1, %v1865_v17, %v1867_v56 }
 0x141   : > { %v2063_v57 = vpack.c.bf16 %v2249_v49, %v2249_v49 }
 0x142   : > { %v1385_v1 = vadd.f32 %v1321_v53, %v1144_v51 }
 0x143   : > { %2096 = vst.msk [vmem:[%s2495_s4 + $0x78] sm:$0xf] %vm2065_vm2, %v2063_v57 }
 0x144   : > { %v1450_v37 = vadd.f32 %v1418_v12, %v1385_v1 }
 0x146   : > { %v1691_v33 = vadd.f32 %v1627_v13, %v1450_v37 }
 0x148   : > { %v1932_v27 = vadd.f32 %v1868_v35, %v1691_v33 }
 0x14a   : > { %vm1968_vm8 = vcmp.ge.f32.partialorder %v1932_v27, %v3551_v9 }
 0x14b   : > { %v2250_v55 = vsel %vm1968_vm8, 1.0, %v2307_v59 }
 0x14c   : > { %v2064_v22 = vpack.c.bf16 %v2250_v55, %v2250_v55 }
 0x14e   : > { %2097 = vst.msk [vmem:[%s2495_s4 + $0x7c] sm:$0xf] %vm2065_vm2, %v2064_v22 }
 0x14f PF: > { %s13_s14 = sadd.s32 1, %s2305_s14   ;;  %s3723_s12 = smov %s2301_s13 }
 0x150   : > { %p10_p5 = scmp.ge.s32.totalorder %s13_s14, 4   ;;  %s3724_s13 = smov %s3726_s15 }
 0x152   :  { %12 = sbr.rel (!%p10_p5) target bundleno = 2 (0x2), region = 68 }

</bundles_post_ra>
